<compile_context>
chip_gen: v7x
topology: tpu7x:2x2x1
jax: 0.10.0
libtpu: 0.0.40
codegen_flags: <defaults>
</compile_context>

<pallas_src>
import functools

import jax
import jax.numpy as jnp
from jax import lax
from jax.experimental import pallas as pl
from jax.experimental.pallas import tpu as pltpu


def _layernorm(x, g, b, eps=1e-5):
    mu = jnp.mean(x, axis=-1, keepdims=True)
    xc = x - mu
    var = jnp.mean(xc * xc, axis=-1, keepdims=True)
    return xc * lax.rsqrt(var + eps) * g + b


def block_kernel(x_ref,
                 ln1_g_ref, ln1_b_ref,
                 wq_ref, bq_ref, wk_ref, bk_ref, wv_ref, bv_ref,
                 wo_ref, bo_ref,
                 ln2_g_ref, ln2_b_ref,
                 w1_ref, c1_ref, w2_ref, c2_ref,
                 y_ref, k_out_ref, v_out_ref,
                 q_scr, k_scr, v_scr,
                 *, heads, dims, q_tile):
    qi = pl.program_id(1)
    T = x_ref.shape[1]
    dh = dims // heads
    scale = 1.0 / (dh ** 0.5)
    bf16 = jnp.bfloat16

    # ---- once per batch element (q-tile 0): LN_attn + q/k/v projections ----
    # Fills the bf16 per-head (H, T, dh) scratch and emits the `present`
    # (k, v) cache blocks, which stay VMEM-resident across all q tiles.
    @pl.when(qi == 0)
    def _():
        x_full = x_ref[0]                                            # (T, D) f32
        a = _layernorm(x_full, ln1_g_ref[...], ln1_b_ref[...]).astype(bf16)
        q = jnp.dot(a, wq_ref[...], preferred_element_type=jnp.float32) + bq_ref[...]
        k = jnp.dot(a, wk_ref[...], preferred_element_type=jnp.float32) + bk_ref[...]
        v = jnp.dot(a, wv_ref[...], preferred_element_type=jnp.float32) + bv_ref[...]
        k_out_ref[0] = k                                             # present k
        v_out_ref[0] = v                                             # present v
        for h in range(heads):          # static; once per batch element
            sl = slice(h * dh, (h + 1) * dh)
            q_scr[h] = (q[:, sl] * scale).astype(bf16)   # scale folded into q
            k_scr[h] = k[:, sl].astype(bf16)
            v_scr[h] = v[:, sl].astype(bf16)

    # ---- every q tile: batched-head attention + out-proj + residual + FFN ----
    row0 = pl.multiple_of(qi * q_tile, q_tile)
    x_t = x_ref[0, pl.ds(row0, q_tile), :]                           # (tq, D) f32
    q_t = q_scr[:, pl.ds(row0, q_tile), :]                           # (H, tq, dh) bf16

    s = jnp.einsum('hqd,hkd->hqk', q_t, k_scr[...],
                   preferred_element_type=jnp.float32)               # (H, tq, T)

    # causal mask generated in-kernel (no (B,T,T) HBM stream)
    rows = row0 + lax.broadcasted_iota(jnp.int32, (q_tile, T), 0)
    cols = lax.broadcasted_iota(jnp.int32, (q_tile, T), 1)
    bias = jnp.where(cols <= rows, 0.0, -1e9)                        # (tq, T) f32
    s = s + bias[None, :, :]

    s = s - jnp.max(s, axis=-1, keepdims=True)
    p = jnp.exp(s)
    p = p * pl.reciprocal(jnp.sum(p, axis=-1, keepdims=True), approx=True)

    o = jnp.einsum('hqk,hkd->hqd', p.astype(bf16), v_scr[...],
                   preferred_element_type=jnp.float32)               # (H, tq, dh)
    # cast each head before the lane-concat so the (tq, D) concat is bf16 and
    # feeds the out-projection matmul directly (no f32 intermediate slab)
    attn = jnp.concatenate([o[h].astype(bf16) for h in range(heads)],
                           axis=-1)                                  # (tq, D) bf16

    attn = jnp.dot(attn, wo_ref[...],
                   preferred_element_type=jnp.float32) + bo_ref[...]
    x1 = x_t + attn                       # residual (dropout == identity, eval)

    h2 = _layernorm(x1, ln2_g_ref[...], ln2_b_ref[...])
    ff = jnp.dot(h2.astype(bf16), w1_ref[...],
                 preferred_element_type=jnp.float32) + c1_ref[...]
    ff = jax.nn.gelu(ff, approximate=True)
    ff = jnp.dot(ff.astype(bf16), w2_ref[...],
                 preferred_element_type=jnp.float32) + c2_ref[...]

    y_ref[0] = x1 + ff


def gpt2_block(x, params, *, heads, q_tile=None):
    B, T, D = x.shape
    hidden = params["w1"].shape[1]
    dh = D // heads
    if q_tile is None:
        q_tile = T if T <= 256 else 256
    assert T % q_tile == 0, "sequence length must be divisible by q_tile"
    nq = T // q_tile

    bf16 = jnp.bfloat16
    # Split the fused qkv weight so k/v never need mid-lane slicing in-kernel,
    # and cast all MXU weight operands to bf16 (f32 accumulation in-kernel).
    wq = params["wqkv"][:, :D].astype(bf16)
    wk = params["wqkv"][:, D:2 * D].astype(bf16)
    wv = params["wqkv"][:, 2 * D:].astype(bf16)
    bq = params["bqkv"][:, :D]
    bk = params["bqkv"][:, D:2 * D]
    bv = params["bqkv"][:, 2 * D:]
    wo = params["wo"].astype(bf16)
    w1 = params["w1"].astype(bf16)
    w2 = params["w2"].astype(bf16)

    def rep_spec(shape):                     # replicated (weights/biases)
        nd = len(shape)
        return pl.BlockSpec(shape, lambda b, q, _nd=nd: (0,) * _nd)

    in_specs = [
        pl.BlockSpec((1, T, D), lambda b, q: (b, 0, 0)),       # x (full seq, resident per b)
        rep_spec((1, D)), rep_spec((1, D)),                    # ln_attn gamma, beta
        rep_spec((D, D)), rep_spec((1, D)),                    # wq, bq
        rep_spec((D, D)), rep_spec((1, D)),                    # wk, bk
        rep_spec((D, D)), rep_spec((1, D)),                    # wv, bv
        rep_spec((D, D)), rep_spec((1, D)),                    # out proj
        rep_spec((1, D)), rep_spec((1, D)),                    # ln_fc gamma, beta
        rep_spec((D, hidden)), rep_spec((1, hidden)),          # fc1
        rep_spec((hidden, D)), rep_spec((1, D)),               # fc2
    ]
    out_specs = [
        pl.BlockSpec((1, q_tile, D), lambda b, q: (b, q, 0)),  # y (tiled over T)
        pl.BlockSpec((1, T, D), lambda b, q: (b, 0, 0)),       # present k (resident)
        pl.BlockSpec((1, T, D), lambda b, q: (b, 0, 0)),       # present v (resident)
    ]
    out_shape = [jax.ShapeDtypeStruct((B, T, D), jnp.float32)] * 3
    scratch_shapes = [
        pltpu.VMEM((heads, T, dh), bf16),                      # q (pre-scaled)
        pltpu.VMEM((heads, T, dh), bf16),                      # k
        pltpu.VMEM((heads, T, dh), bf16),                      # v
    ]

    flops = 2 * B * T * (3 * D * D + 2 * T * D + D * D + 2 * D * hidden)
    transcendentals = B * (heads * T * T + T * hidden)
    bytes_accessed = (4 * B * T * D * 4                        # x in, y/k/v out (f32)
                      + 2 * (4 * D * D + 2 * D * hidden)       # bf16 weights
                      + 4 * (8 * D + hidden))                  # f32 biases / LN params

    kern = functools.partial(block_kernel, heads=heads, dims=D, q_tile=q_tile)
    y, k, v = pl.pallas_call(
        kern,
        grid=(B, nq),
        in_specs=in_specs,
        out_specs=out_specs,
        out_shape=out_shape,
        scratch_shapes=scratch_shapes,
        compiler_params=pltpu.CompilerParams(
            # batch axis parallel (megacore); q-tile axis carries scratch state
            dimension_semantics=("parallel", "arbitrary"),
            vmem_limit_bytes=48 * 1024 * 1024),
        cost_estimate=pl.CostEstimate(
            flops=flops, transcendentals=transcendentals,
            bytes_accessed=bytes_accessed),
    )(x,
      params["ln1_g"], params["ln1_b"],
      wq, bq, wk, bk, wv, bv,
      wo, params["bo"],
      params["ln2_g"], params["ln2_b"],
      w1, params["c1"],
      w2, params["c2"])
    return y, (k, v)


def reference_block(x, params, *, heads):
    """Plain-JAX f32 reference with identical semantics (for verification)."""
    B, T, D = x.shape
    dh = D // heads
    a = _layernorm(x, params["ln1_g"][0], params["ln1_b"][0])
    qkv = a @ params["wqkv"] + params["bqkv"][0]
    q, k, v = qkv[..., :D], qkv[..., D:2 * D], qkv[..., 2 * D:]
    qh = q.reshape(B, T, heads, dh).transpose(0, 2, 1, 3)
    kh = k.reshape(B, T, heads, dh).transpose(0, 2, 1, 3)
    vh = v.reshape(B, T, heads, dh).transpose(0, 2, 1, 3)
    s = jnp.einsum("bhqd,bhkd->bhqk", qh, kh) / (dh ** 0.5)
    causal = jnp.arange(T)[None, :] > jnp.arange(T)[:, None]
    s = s + jnp.where(causal, -1e9, 0.0)[None, None]
    p = jax.nn.softmax(s, axis=-1)
    o = jnp.einsum("bhqk,bhkd->bhqd", p, vh).transpose(0, 2, 1, 3).reshape(B, T, D)
    o = o @ params["wo"] + params["bo"][0]
    x1 = x + o
    h2 = _layernorm(x1, params["ln2_g"][0], params["ln2_b"][0])
    ff = jax.nn.gelu(h2 @ params["w1"] + params["c1"][0], approximate=True)
    ff = ff @ params["w2"] + params["c2"][0]
    return x1 + ff, (k, v)


def init_params(key, dims, heads, rate):
    hidden = dims * rate
    ks = jax.random.split(key, 4)
    std = 0.02
    return {
        "ln1_g": jnp.ones((1, dims), jnp.float32),
        "ln1_b": jnp.zeros((1, dims), jnp.float32),
        "wqkv": std * jax.random.normal(ks[0], (dims, 3 * dims), jnp.float32),
        "bqkv": jnp.zeros((1, 3 * dims), jnp.float32),
        "wo": std * jax.random.normal(ks[1], (dims, dims), jnp.float32),
        "bo": jnp.zeros((1, dims), jnp.float32),
        "ln2_g": jnp.ones((1, dims), jnp.float32),
        "ln2_b": jnp.zeros((1, dims), jnp.float32),
        "w1": std * jax.random.normal(ks[2], (dims, hidden), jnp.float32),
        "c1": jnp.zeros((1, hidden), jnp.float32),
        "w2": std * jax.random.normal(ks[3], (hidden, dims), jnp.float32),
        "c2": jnp.zeros((1, dims), jnp.float32),
    }


if __name__ == "__main__":
    B, T, heads, dims, rate = 2, 8, 4, 32, 4
    key = jax.random.PRNGKey(0)
    kx, kp = jax.random.split(key)

    x = jax.random.normal(kx, (B, T, dims), jnp.float32)
    params = init_params(kp, dims, heads, rate)

    y, (k_out, v_out) = gpt2_block(x, params, heads=heads)
    jax.block_until_ready((y, k_out, v_out))

    y_ref, (k_ref, v_ref) = reference_block(x, params, heads=heads)
    # bf16 MXU operands + approx reciprocal -> loosened tolerance vs f32 reference
    assert jnp.allclose(y, y_ref, atol=2e-2, rtol=2e-2), "output mismatch"
    assert jnp.allclose(k_out, k_ref, atol=2e-2, rtol=2e-2), "present-k mismatch"
    assert jnp.allclose(v_out, v_ref, atol=2e-2, rtol=2e-2), "present-v mismatch"

    print("KERNEL_OK")
</pallas_src>

<mosaic_0001>
module attributes {stable_mosaic.version = 11 : i64} {
  func.func @block_kernel(%arg0: i32, %arg1: i32, %arg2: memref<1x8x32xf32, #tpu.memory_space<vmem>>, %arg3: memref<1x32xf32, #tpu.memory_space<vmem>>, %arg4: memref<1x32xf32, #tpu.memory_space<vmem>>, %arg5: memref<32x32xbf16, #tpu.memory_space<vmem>>, %arg6: memref<1x32xf32, #tpu.memory_space<vmem>>, %arg7: memref<32x32xbf16, #tpu.memory_space<vmem>>, %arg8: memref<1x32xf32, #tpu.memory_space<vmem>>, %arg9: memref<32x32xbf16, #tpu.memory_space<vmem>>, %arg10: memref<1x32xf32, #tpu.memory_space<vmem>>, %arg11: memref<32x32xbf16, #tpu.memory_space<vmem>>, %arg12: memref<1x32xf32, #tpu.memory_space<vmem>>, %arg13: memref<1x32xf32, #tpu.memory_space<vmem>>, %arg14: memref<1x32xf32, #tpu.memory_space<vmem>>, %arg15: memref<32x128xbf16, #tpu.memory_space<vmem>>, %arg16: memref<1x128xf32, #tpu.memory_space<vmem>>, %arg17: memref<128x32xbf16, #tpu.memory_space<vmem>>, %arg18: memref<1x32xf32, #tpu.memory_space<vmem>>, %arg19: memref<1x8x32xf32, #tpu.memory_space<vmem>>, %arg20: memref<1x8x32xf32, #tpu.memory_space<vmem>>, %arg21: memref<1x8x32xf32, #tpu.memory_space<vmem>>, %arg22: memref<4x8x8xbf16, #tpu.memory_space<vmem>>, %arg23: memref<4x8x8xbf16, #tpu.memory_space<vmem>>, %arg24: memref<4x8x8xbf16, #tpu.memory_space<vmem>>) attributes {dimension_semantics = [#tpu.dimension_semantics<parallel>, #tpu.dimension_semantics<arbitrary>], iteration_bounds = array<i64: 2, 1>, scalar_prefetch = 0 : i64, scratch_operands = 3 : i64, tpu.core_type = #tpu.core_type<tc>, window_params = [{transform_indices = @transform_0, window_bounds = array<i64: 1, 8, 32>}, {pipeline_mode = #tpu.pipeline_mode<synchronous>, transform_indices = @transform_1, window_bounds = array<i64: 1, 32>}, {pipeline_mode = #tpu.pipeline_mode<synchronous>, transform_indices = @transform_2, window_bounds = array<i64: 1, 32>}, {pipeline_mode = #tpu.pipeline_mode<synchronous>, transform_indices = @transform_3, window_bounds = array<i64: 32, 32>}, {pipeline_mode = #tpu.pipeline_mode<synchronous>, transform_indices = @transform_4, window_bounds = array<i64: 1, 32>}, {pipeline_mode = #tpu.pipeline_mode<synchronous>, transform_indices = @transform_5, window_bounds = array<i64: 32, 32>}, {pipeline_mode = #tpu.pipeline_mode<synchronous>, transform_indices = @transform_6, window_bounds = array<i64: 1, 32>}, {pipeline_mode = #tpu.pipeline_mode<synchronous>, transform_indices = @transform_7, window_bounds = array<i64: 32, 32>}, {pipeline_mode = #tpu.pipeline_mode<synchronous>, transform_indices = @transform_8, window_bounds = array<i64: 1, 32>}, {pipeline_mode = #tpu.pipeline_mode<synchronous>, transform_indices = @transform_9, window_bounds = array<i64: 32, 32>}, {pipeline_mode = #tpu.pipeline_mode<synchronous>, transform_indices = @transform_10, window_bounds = array<i64: 1, 32>}, {pipeline_mode = #tpu.pipeline_mode<synchronous>, transform_indices = @transform_11, window_bounds = array<i64: 1, 32>}, {pipeline_mode = #tpu.pipeline_mode<synchronous>, transform_indices = @transform_12, window_bounds = array<i64: 1, 32>}, {pipeline_mode = #tpu.pipeline_mode<synchronous>, transform_indices = @transform_13, window_bounds = array<i64: 32, 128>}, {pipeline_mode = #tpu.pipeline_mode<synchronous>, transform_indices = @transform_14, window_bounds = array<i64: 1, 128>}, {pipeline_mode = #tpu.pipeline_mode<synchronous>, transform_indices = @transform_15, window_bounds = array<i64: 128, 32>}, {pipeline_mode = #tpu.pipeline_mode<synchronous>, transform_indices = @transform_16, window_bounds = array<i64: 1, 32>}, {transform_indices = @transform_17, window_bounds = array<i64: 1, 8, 32>}, {transform_indices = @transform_18, window_bounds = array<i64: 1, 8, 32>}, {transform_indices = @transform_19, window_bounds = array<i64: 1, 8, 32>}]} {
    %c0_i32 = arith.constant 0 : i32
    %0 = arith.cmpi eq, %arg1, %c0_i32 : i32
    %1 = arith.extui %0 : i1 to i32
    %c0_i32_0 = arith.constant 0 : i32
    %2 = arith.cmpi ne, %1, %c0_i32_0 : i32
    scf.if %2 {
      %c0_46 = arith.constant 0 : index
      %c0_47 = arith.constant 0 : index
      %c0_48 = arith.constant 0 : index
      %106 = vector.load %arg2[%c0_46, %c0_47, %c0_48] : memref<1x8x32xf32, #tpu.memory_space<vmem>>, vector<1x8x32xf32>
      %107 = vector.shape_cast %106 : vector<1x8x32xf32> to vector<8x32xf32>
      %c0_49 = arith.constant 0 : index
      %c0_50 = arith.constant 0 : index
      %108 = vector.load %arg3[%c0_49, %c0_50] : memref<1x32xf32, #tpu.memory_space<vmem>>, vector<1x32xf32>
      %c0_51 = arith.constant 0 : index
      %c0_52 = arith.constant 0 : index
      %109 = vector.load %arg4[%c0_51, %c0_52] : memref<1x32xf32, #tpu.memory_space<vmem>>, vector<1x32xf32>
      %cst_53 = arith.constant dense<0.000000e+00> : vector<8xf32>
      %110 = vector.multi_reduction <add>, %107, %cst_53 [1] : vector<8x32xf32> to vector<8xf32>
      %111 = vector.shape_cast %110 : vector<8xf32> to vector<8x1xf32>
      %cst_54 = arith.constant 3.200000e+01 : f32
      %112 = vector.broadcast %cst_54 : f32 to vector<8x1xf32>
      %113 = arith.divf %111, %112 : vector<8x1xf32>
      %114 = vector.broadcast %113 : vector<8x1xf32> to vector<8x32xf32>
      %115 = arith.subf %107, %114 : vector<8x32xf32>
      %116 = arith.mulf %115, %115 : vector<8x32xf32>
      %cst_55 = arith.constant dense<0.000000e+00> : vector<8xf32>
      %117 = vector.multi_reduction <add>, %116, %cst_55 [1] : vector<8x32xf32> to vector<8xf32>
      %118 = vector.shape_cast %117 : vector<8xf32> to vector<8x1xf32>
      %cst_56 = arith.constant 3.200000e+01 : f32
      %119 = vector.broadcast %cst_56 : f32 to vector<8x1xf32>
      %120 = arith.divf %118, %119 : vector<8x1xf32>
      %cst_57 = arith.constant 9.99999974E-6 : f32
      %121 = vector.broadcast %cst_57 : f32 to vector<8x1xf32>
      %122 = arith.addf %120, %121 : vector<8x1xf32>
      %123 = math.rsqrt %122 : vector<8x1xf32>
      %124 = vector.broadcast %123 : vector<8x1xf32> to vector<8x32xf32>
      %125 = arith.mulf %115, %124 : vector<8x32xf32>
      %126 = vector.broadcast %108 : vector<1x32xf32> to vector<8x32xf32>
      %127 = arith.mulf %125, %126 : vector<8x32xf32>
      %128 = vector.broadcast %109 : vector<1x32xf32> to vector<8x32xf32>
      %129 = arith.addf %127, %128 : vector<8x32xf32>
      %130 = arith.truncf %129 : vector<8x32xf32> to vector<8x32xbf16>
      %c0_58 = arith.constant 0 : index
      %c0_59 = arith.constant 0 : index
      %131 = vector.load %arg5[%c0_58, %c0_59] : memref<32x32xbf16, #tpu.memory_space<vmem>>, vector<32x32xbf16>
      %cst_60 = arith.constant dense<0.000000e+00> : vector<8x32xf32>
      %132 = tpu.matmul %130, %131, %cst_60 {dimension_numbers = #tpu.dot_dimension_numbers<[1], [0], [0], [1], [0, 0, 1, 1], [], []>} : vector<8x32xbf16>, vector<32x32xbf16>, vector<8x32xf32> -> vector<8x32xf32>
      %c0_61 = arith.constant 0 : index
      %c0_62 = arith.constant 0 : index
      %133 = vector.load %arg6[%c0_61, %c0_62] : memref<1x32xf32, #tpu.memory_space<vmem>>, vector<1x32xf32>
      %134 = vector.broadcast %133 : vector<1x32xf32> to vector<8x32xf32>
      %135 = arith.addf %132, %134 : vector<8x32xf32>
      %c0_63 = arith.constant 0 : index
      %c0_64 = arith.constant 0 : index
      %136 = vector.load %arg7[%c0_63, %c0_64] : memref<32x32xbf16, #tpu.memory_space<vmem>>, vector<32x32xbf16>
      %cst_65 = arith.constant dense<0.000000e+00> : vector<8x32xf32>
      %137 = tpu.matmul %130, %136, %cst_65 {dimension_numbers = #tpu.dot_dimension_numbers<[1], [0], [0], [1], [0, 0, 1, 1], [], []>} : vector<8x32xbf16>, vector<32x32xbf16>, vector<8x32xf32> -> vector<8x32xf32>
      %c0_66 = arith.constant 0 : index
      %c0_67 = arith.constant 0 : index
      %138 = vector.load %arg8[%c0_66, %c0_67] : memref<1x32xf32, #tpu.memory_space<vmem>>, vector<1x32xf32>
      %139 = vector.broadcast %138 : vector<1x32xf32> to vector<8x32xf32>
      %140 = arith.addf %137, %139 : vector<8x32xf32>
      %c0_68 = arith.constant 0 : index
      %c0_69 = arith.constant 0 : index
      %141 = vector.load %arg9[%c0_68, %c0_69] : memref<32x32xbf16, #tpu.memory_space<vmem>>, vector<32x32xbf16>
      %cst_70 = arith.constant dense<0.000000e+00> : vector<8x32xf32>
      %142 = tpu.matmul %130, %141, %cst_70 {dimension_numbers = #tpu.dot_dimension_numbers<[1], [0], [0], [1], [0, 0, 1, 1], [], []>} : vector<8x32xbf16>, vector<32x32xbf16>, vector<8x32xf32> -> vector<8x32xf32>
      %c0_71 = arith.constant 0 : index
      %c0_72 = arith.constant 0 : index
      %143 = vector.load %arg10[%c0_71, %c0_72] : memref<1x32xf32, #tpu.memory_space<vmem>>, vector<1x32xf32>
      %144 = vector.broadcast %143 : vector<1x32xf32> to vector<8x32xf32>
      %145 = arith.addf %142, %144 : vector<8x32xf32>
      %c0_73 = arith.constant 0 : index
      %c0_74 = arith.constant 0 : index
      %c0_75 = arith.constant 0 : index
      %146 = vector.load %arg20[%c0_73, %c0_74, %c0_75] : memref<1x8x32xf32, #tpu.memory_space<vmem>>, vector<1x8x32xf32>
      %147 = vector.shape_cast %146 : vector<1x8x32xf32> to vector<8x32xf32>
      %148 = vector.shape_cast %140 : vector<8x32xf32> to vector<1x8x32xf32>
      tpu.vector_store %arg20[%c0_73, %c0_74, %c0_75], %148 {strides = array<i32>} : memref<1x8x32xf32, #tpu.memory_space<vmem>>, vector<1x8x32xf32>,
      %c0_76 = arith.constant 0 : index
      %c0_77 = arith.constant 0 : index
      %c0_78 = arith.constant 0 : index
      %149 = vector.load %arg21[%c0_76, %c0_77, %c0_78] : memref<1x8x32xf32, #tpu.memory_space<vmem>>, vector<1x8x32xf32>
      %150 = vector.shape_cast %149 : vector<1x8x32xf32> to vector<8x32xf32>
      %151 = vector.shape_cast %145 : vector<8x32xf32> to vector<1x8x32xf32>
      tpu.vector_store %arg21[%c0_76, %c0_77, %c0_78], %151 {strides = array<i32>} : memref<1x8x32xf32, #tpu.memory_space<vmem>>, vector<1x8x32xf32>,
      %152 = vector.extract_strided_slice %135 {offsets = [0, 0], sizes = [8, 8], strides = [1, 1]} : vector<8x32xf32> to vector<8x8xf32>
      %cst_79 = arith.constant 0.353553385 : f32
      %153 = vector.broadcast %cst_79 : f32 to vector<8x8xf32>
      %154 = arith.mulf %152, %153 : vector<8x8xf32>
      %155 = arith.truncf %154 : vector<8x8xf32> to vector<8x8xbf16>
      %c0_80 = arith.constant 0 : index
      %c0_81 = arith.constant 0 : index
      %c0_82 = arith.constant 0 : index
      %156 = vector.load %arg22[%c0_80, %c0_81, %c0_82] : memref<4x8x8xbf16, #tpu.memory_space<vmem>>, vector<1x8x8xbf16>
      %157 = vector.shape_cast %156 : vector<1x8x8xbf16> to vector<8x8xbf16>
      %158 = vector.shape_cast %155 : vector<8x8xbf16> to vector<1x8x8xbf16>
      tpu.vector_store %arg22[%c0_80, %c0_81, %c0_82], %158 {strides = array<i32>} : memref<4x8x8xbf16, #tpu.memory_space<vmem>>, vector<1x8x8xbf16>,
      %159 = vector.extract_strided_slice %140 {offsets = [0, 0], sizes = [8, 8], strides = [1, 1]} : vector<8x32xf32> to vector<8x8xf32>
      %160 = arith.truncf %159 : vector<8x8xf32> to vector<8x8xbf16>
      %c0_83 = arith.constant 0 : index
      %c0_84 = arith.constant 0 : index
      %c0_85 = arith.constant 0 : index
      %161 = vector.load %arg23[%c0_83, %c0_84, %c0_85] : memref<4x8x8xbf16, #tpu.memory_space<vmem>>, vector<1x8x8xbf16>
      %162 = vector.shape_cast %161 : vector<1x8x8xbf16> to vector<8x8xbf16>
      %163 = vector.shape_cast %160 : vector<8x8xbf16> to vector<1x8x8xbf16>
      tpu.vector_store %arg23[%c0_83, %c0_84, %c0_85], %163 {strides = array<i32>} : memref<4x8x8xbf16, #tpu.memory_space<vmem>>, vector<1x8x8xbf16>,
      %164 = vector.extract_strided_slice %145 {offsets = [0, 0], sizes = [8, 8], strides = [1, 1]} : vector<8x32xf32> to vector<8x8xf32>
      %165 = arith.truncf %164 : vector<8x8xf32> to vector<8x8xbf16>
      %c0_86 = arith.constant 0 : index
      %c0_87 = arith.constant 0 : index
      %c0_88 = arith.constant 0 : index
      %166 = vector.load %arg24[%c0_86, %c0_87, %c0_88] : memref<4x8x8xbf16, #tpu.memory_space<vmem>>, vector<1x8x8xbf16>
      %167 = vector.shape_cast %166 : vector<1x8x8xbf16> to vector<8x8xbf16>
      %168 = vector.shape_cast %165 : vector<8x8xbf16> to vector<1x8x8xbf16>
      tpu.vector_store %arg24[%c0_86, %c0_87, %c0_88], %168 {strides = array<i32>} : memref<4x8x8xbf16, #tpu.memory_space<vmem>>, vector<1x8x8xbf16>,
      %169 = vector.extract_strided_slice %135 {offsets = [0, 8], sizes = [8, 8], strides = [1, 1]} : vector<8x32xf32> to vector<8x8xf32>
      %cst_89 = arith.constant 0.353553385 : f32
      %170 = vector.broadcast %cst_89 : f32 to vector<8x8xf32>
      %171 = arith.mulf %169, %170 : vector<8x8xf32>
      %172 = arith.truncf %171 : vector<8x8xf32> to vector<8x8xbf16>
      %c1 = arith.constant 1 : index
      %c0_90 = arith.constant 0 : index
      %c0_91 = arith.constant 0 : index
      %173 = vector.load %arg22[%c1, %c0_90, %c0_91] : memref<4x8x8xbf16, #tpu.memory_space<vmem>>, vector<1x8x8xbf16>
      %174 = vector.shape_cast %173 : vector<1x8x8xbf16> to vector<8x8xbf16>
      %175 = vector.shape_cast %172 : vector<8x8xbf16> to vector<1x8x8xbf16>
      tpu.vector_store %arg22[%c1, %c0_90, %c0_91], %175 {strides = array<i32>} : memref<4x8x8xbf16, #tpu.memory_space<vmem>>, vector<1x8x8xbf16>,
      %176 = vector.extract_strided_slice %140 {offsets = [0, 8], sizes = [8, 8], strides = [1, 1]} : vector<8x32xf32> to vector<8x8xf32>
      %177 = arith.truncf %176 : vector<8x8xf32> to vector<8x8xbf16>
      %c1_92 = arith.constant 1 : index
      %c0_93 = arith.constant 0 : index
      %c0_94 = arith.constant 0 : index
      %178 = vector.load %arg23[%c1_92, %c0_93, %c0_94] : memref<4x8x8xbf16, #tpu.memory_space<vmem>>, vector<1x8x8xbf16>
      %179 = vector.shape_cast %178 : vector<1x8x8xbf16> to vector<8x8xbf16>
      %180 = vector.shape_cast %177 : vector<8x8xbf16> to vector<1x8x8xbf16>
      tpu.vector_store %arg23[%c1_92, %c0_93, %c0_94], %180 {strides = array<i32>} : memref<4x8x8xbf16, #tpu.memory_space<vmem>>, vector<1x8x8xbf16>,
      %181 = vector.extract_strided_slice %145 {offsets = [0, 8], sizes = [8, 8], strides = [1, 1]} : vector<8x32xf32> to vector<8x8xf32>
      %182 = arith.truncf %181 : vector<8x8xf32> to vector<8x8xbf16>
      %c1_95 = arith.constant 1 : index
      %c0_96 = arith.constant 0 : index
      %c0_97 = arith.constant 0 : index
      %183 = vector.load %arg24[%c1_95, %c0_96, %c0_97] : memref<4x8x8xbf16, #tpu.memory_space<vmem>>, vector<1x8x8xbf16>
      %184 = vector.shape_cast %183 : vector<1x8x8xbf16> to vector<8x8xbf16>
      %185 = vector.shape_cast %182 : vector<8x8xbf16> to vector<1x8x8xbf16>
      tpu.vector_store %arg24[%c1_95, %c0_96, %c0_97], %185 {strides = array<i32>} : memref<4x8x8xbf16, #tpu.memory_space<vmem>>, vector<1x8x8xbf16>,
      %186 = vector.extract_strided_slice %135 {offsets = [0, 16], sizes = [8, 8], strides = [1, 1]} : vector<8x32xf32> to vector<8x8xf32>
      %cst_98 = arith.constant 0.353553385 : f32
      %187 = vector.broadcast %cst_98 : f32 to vector<8x8xf32>
      %188 = arith.mulf %186, %187 : vector<8x8xf32>
      %189 = arith.truncf %188 : vector<8x8xf32> to vector<8x8xbf16>
      %c2 = arith.constant 2 : index
      %c0_99 = arith.constant 0 : index
      %c0_100 = arith.constant 0 : index
      %190 = vector.load %arg22[%c2, %c0_99, %c0_100] : memref<4x8x8xbf16, #tpu.memory_space<vmem>>, vector<1x8x8xbf16>
      %191 = vector.shape_cast %190 : vector<1x8x8xbf16> to vector<8x8xbf16>
      %192 = vector.shape_cast %189 : vector<8x8xbf16> to vector<1x8x8xbf16>
      tpu.vector_store %arg22[%c2, %c0_99, %c0_100], %192 {strides = array<i32>} : memref<4x8x8xbf16, #tpu.memory_space<vmem>>, vector<1x8x8xbf16>,
      %193 = vector.extract_strided_slice %140 {offsets = [0, 16], sizes = [8, 8], strides = [1, 1]} : vector<8x32xf32> to vector<8x8xf32>
      %194 = arith.truncf %193 : vector<8x8xf32> to vector<8x8xbf16>
      %c2_101 = arith.constant 2 : index
      %c0_102 = arith.constant 0 : index
      %c0_103 = arith.constant 0 : index
      %195 = vector.load %arg23[%c2_101, %c0_102, %c0_103] : memref<4x8x8xbf16, #tpu.memory_space<vmem>>, vector<1x8x8xbf16>
      %196 = vector.shape_cast %195 : vector<1x8x8xbf16> to vector<8x8xbf16>
      %197 = vector.shape_cast %194 : vector<8x8xbf16> to vector<1x8x8xbf16>
      tpu.vector_store %arg23[%c2_101, %c0_102, %c0_103], %197 {strides = array<i32>} : memref<4x8x8xbf16, #tpu.memory_space<vmem>>, vector<1x8x8xbf16>,
      %198 = vector.extract_strided_slice %145 {offsets = [0, 16], sizes = [8, 8], strides = [1, 1]} : vector<8x32xf32> to vector<8x8xf32>
      %199 = arith.truncf %198 : vector<8x8xf32> to vector<8x8xbf16>
      %c2_104 = arith.constant 2 : index
      %c0_105 = arith.constant 0 : index
      %c0_106 = arith.constant 0 : index
      %200 = vector.load %arg24[%c2_104, %c0_105, %c0_106] : memref<4x8x8xbf16, #tpu.memory_space<vmem>>, vector<1x8x8xbf16>
      %201 = vector.shape_cast %200 : vector<1x8x8xbf16> to vector<8x8xbf16>
      %202 = vector.shape_cast %199 : vector<8x8xbf16> to vector<1x8x8xbf16>
      tpu.vector_store %arg24[%c2_104, %c0_105, %c0_106], %202 {strides = array<i32>} : memref<4x8x8xbf16, #tpu.memory_space<vmem>>, vector<1x8x8xbf16>,
      %203 = vector.extract_strided_slice %135 {offsets = [0, 24], sizes = [8, 8], strides = [1, 1]} : vector<8x32xf32> to vector<8x8xf32>
      %cst_107 = arith.constant 0.353553385 : f32
      %204 = vector.broadcast %cst_107 : f32 to vector<8x8xf32>
      %205 = arith.mulf %203, %204 : vector<8x8xf32>
      %206 = arith.truncf %205 : vector<8x8xf32> to vector<8x8xbf16>
      %c3 = arith.constant 3 : index
      %c0_108 = arith.constant 0 : index
      %c0_109 = arith.constant 0 : index
      %207 = vector.load %arg22[%c3, %c0_108, %c0_109] : memref<4x8x8xbf16, #tpu.memory_space<vmem>>, vector<1x8x8xbf16>
      %208 = vector.shape_cast %207 : vector<1x8x8xbf16> to vector<8x8xbf16>
      %209 = vector.shape_cast %206 : vector<8x8xbf16> to vector<1x8x8xbf16>
      tpu.vector_store %arg22[%c3, %c0_108, %c0_109], %209 {strides = array<i32>} : memref<4x8x8xbf16, #tpu.memory_space<vmem>>, vector<1x8x8xbf16>,
      %210 = vector.extract_strided_slice %140 {offsets = [0, 24], sizes = [8, 8], strides = [1, 1]} : vector<8x32xf32> to vector<8x8xf32>
      %211 = arith.truncf %210 : vector<8x8xf32> to vector<8x8xbf16>
      %c3_110 = arith.constant 3 : index
      %c0_111 = arith.constant 0 : index
      %c0_112 = arith.constant 0 : index
      %212 = vector.load %arg23[%c3_110, %c0_111, %c0_112] : memref<4x8x8xbf16, #tpu.memory_space<vmem>>, vector<1x8x8xbf16>
      %213 = vector.shape_cast %212 : vector<1x8x8xbf16> to vector<8x8xbf16>
      %214 = vector.shape_cast %211 : vector<8x8xbf16> to vector<1x8x8xbf16>
      tpu.vector_store %arg23[%c3_110, %c0_111, %c0_112], %214 {strides = array<i32>} : memref<4x8x8xbf16, #tpu.memory_space<vmem>>, vector<1x8x8xbf16>,
      %215 = vector.extract_strided_slice %145 {offsets = [0, 24], sizes = [8, 8], strides = [1, 1]} : vector<8x32xf32> to vector<8x8xf32>
      %216 = arith.truncf %215 : vector<8x8xf32> to vector<8x8xbf16>
      %c3_113 = arith.constant 3 : index
      %c0_114 = arith.constant 0 : index
      %c0_115 = arith.constant 0 : index
      %217 = vector.load %arg24[%c3_113, %c0_114, %c0_115] : memref<4x8x8xbf16, #tpu.memory_space<vmem>>, vector<1x8x8xbf16>
      %218 = vector.shape_cast %217 : vector<1x8x8xbf16> to vector<8x8xbf16>
      %219 = vector.shape_cast %216 : vector<8x8xbf16> to vector<1x8x8xbf16>
      tpu.vector_store %arg24[%c3_113, %c0_114, %c0_115], %219 {strides = array<i32>} : memref<4x8x8xbf16, #tpu.memory_space<vmem>>, vector<1x8x8xbf16>,
    } else {
    }
    %c8_i32 = arith.constant 8 : i32
    %3 = arith.muli %arg1, %c8_i32 : i32
    %4 = tpu.assume_multiple %3, 8 : i32
    %c0 = arith.constant 0 : index
    %5 = arith.index_cast %4 : i32 to index
    %c0_1 = arith.constant 0 : index
    %6 = vector.load %arg2[%c0, %5, %c0_1] : memref<1x8x32xf32, #tpu.memory_space<vmem>>, vector<1x8x32xf32>
    %7 = vector.shape_cast %6 : vector<1x8x32xf32> to vector<8x32xf32>
    %c0_2 = arith.constant 0 : index
    %8 = arith.index_cast %4 : i32 to index
    %c0_3 = arith.constant 0 : index
    %9 = vector.load %arg22[%c0_2, %8, %c0_3] : memref<4x8x8xbf16, #tpu.memory_space<vmem>>, vector<4x8x8xbf16>
    %c0_4 = arith.constant 0 : index
    %c0_5 = arith.constant 0 : index
    %c0_6 = arith.constant 0 : index
    %10 = vector.load %arg23[%c0_4, %c0_5, %c0_6] : memref<4x8x8xbf16, #tpu.memory_space<vmem>>, vector<4x8x8xbf16>
    "tpu.trace_start"() <{level = 10 : i32, message = "hqd,hkd->hqk"}> : () -> ()
    %cst = arith.constant dense<0.000000e+00> : vector<4x8x8xf32>
    %11 = tpu.matmul %9, %10, %cst {dimension_numbers = #tpu.dot_dimension_numbers<[2], [2], [1], [1], [0, 0, 0, 1, 1, 1], [0], [0]>} : vector<4x8x8xbf16>, vector<4x8x8xbf16>, vector<4x8x8xf32> -> vector<4x8x8xf32>
    "tpu.trace_stop"() : () -> ()
    %12 = tpu.iota {dimensions = array<i32: 0>} : vector<8x8xi32>
    %13 = vector.broadcast %4 : i32 to vector<8x8xi32>
    %14 = arith.addi %13, %12 : vector<8x8xi32>
    %15 = tpu.iota {dimensions = array<i32: 1>} : vector<8x8xi32>
    %16 = arith.cmpi sle, %15, %14 : vector<8x8xi32>
    %cst_7 = arith.constant 0.000000e+00 : f32
    %cst_8 = arith.constant -1.000000e+09 : f32
    %17 = vector.broadcast %cst_7 : f32 to vector<8x8xf32>
    %18 = vector.broadcast %cst_8 : f32 to vector<8x8xf32>
    %19 = arith.select %16, %17, %18 : vector<8x8xi1>, vector<8x8xf32>
    %20 = vector.shape_cast %19 : vector<8x8xf32> to vector<1x8x8xf32>
    %21 = vector.broadcast %20 : vector<1x8x8xf32> to vector<4x8x8xf32>
    %22 = arith.addf %11, %21 : vector<4x8x8xf32>
    %cst_9 = arith.constant dense<0xFF800000> : vector<4x8xf32>
    %23 = vector.multi_reduction <maximumf>, %22, %cst_9 [2] : vector<4x8x8xf32> to vector<4x8xf32>
    %24 = vector.shape_cast %23 : vector<4x8xf32> to vector<4x8x1xf32>
    %25 = vector.broadcast %24 : vector<4x8x1xf32> to vector<4x8x8xf32>
    %26 = arith.subf %22, %25 : vector<4x8x8xf32>
    %27 = math.exp %26 : vector<4x8x8xf32>
    %cst_10 = arith.constant dense<0.000000e+00> : vector<4x8xf32>
    %28 = vector.multi_reduction <add>, %27, %cst_10 [2] : vector<4x8x8xf32> to vector<4x8xf32>
    %29 = vector.shape_cast %28 : vector<4x8xf32> to vector<4x8x1xf32>
    %30 = tpu.reciprocal %29 {approx = true} : vector<4x8x1xf32> -> vector<4x8x1xf32>
    %31 = vector.broadcast %30 : vector<4x8x1xf32> to vector<4x8x8xf32>
    %32 = arith.mulf %27, %31 : vector<4x8x8xf32>
    %33 = arith.truncf %32 : vector<4x8x8xf32> to vector<4x8x8xbf16>
    %c0_11 = arith.constant 0 : index
    %c0_12 = arith.constant 0 : index
    %c0_13 = arith.constant 0 : index
    %34 = vector.load %arg24[%c0_11, %c0_12, %c0_13] : memref<4x8x8xbf16, #tpu.memory_space<vmem>>, vector<4x8x8xbf16>
    "tpu.trace_start"() <{level = 10 : i32, message = "hqk,hkd->hqd"}> : () -> ()
    %cst_14 = arith.constant dense<0.000000e+00> : vector<4x8x8xf32>
    %35 = tpu.matmul %33, %34, %cst_14 {dimension_numbers = #tpu.dot_dimension_numbers<[2], [1], [1], [2], [0, 0, 0, 1, 1, 2], [0], [0]>} : vector<4x8x8xbf16>, vector<4x8x8xbf16>, vector<4x8x8xf32> -> vector<4x8x8xf32>
    "tpu.trace_stop"() : () -> ()
    %36 = vector.extract_strided_slice %35 {offsets = [0, 0, 0], sizes = [1, 8, 8], strides = [1, 1, 1]} : vector<4x8x8xf32> to vector<1x8x8xf32>
    %37 = vector.shape_cast %36 : vector<1x8x8xf32> to vector<8x8xf32>
    %38 = arith.truncf %37 : vector<8x8xf32> to vector<8x8xbf16>
    %39 = vector.extract_strided_slice %35 {offsets = [1, 0, 0], sizes = [1, 8, 8], strides = [1, 1, 1]} : vector<4x8x8xf32> to vector<1x8x8xf32>
    %40 = vector.shape_cast %39 : vector<1x8x8xf32> to vector<8x8xf32>
    %41 = arith.truncf %40 : vector<8x8xf32> to vector<8x8xbf16>
    %42 = vector.extract_strided_slice %35 {offsets = [2, 0, 0], sizes = [1, 8, 8], strides = [1, 1, 1]} : vector<4x8x8xf32> to vector<1x8x8xf32>
    %43 = vector.shape_cast %42 : vector<1x8x8xf32> to vector<8x8xf32>
    %44 = arith.truncf %43 : vector<8x8xf32> to vector<8x8xbf16>
    %45 = vector.extract_strided_slice %35 {offsets = [3, 0, 0], sizes = [1, 8, 8], strides = [1, 1, 1]} : vector<4x8x8xf32> to vector<1x8x8xf32>
    %46 = vector.shape_cast %45 : vector<1x8x8xf32> to vector<8x8xf32>
    %47 = arith.truncf %46 : vector<8x8xf32> to vector<8x8xbf16>
    %48 = tpu.concatenate %38, %41, %44, %47 in 1 : vector<8x8xbf16>, vector<8x8xbf16>, vector<8x8xbf16>, vector<8x8xbf16> -> vector<8x32xbf16>
    %c0_15 = arith.constant 0 : index
    %c0_16 = arith.constant 0 : index
    %49 = vector.load %arg11[%c0_15, %c0_16] : memref<32x32xbf16, #tpu.memory_space<vmem>>, vector<32x32xbf16>
    %cst_17 = arith.constant dense<0.000000e+00> : vector<8x32xf32>
    %50 = tpu.matmul %48, %49, %cst_17 {dimension_numbers = #tpu.dot_dimension_numbers<[1], [0], [0], [1], [0, 0, 1, 1], [], []>} : vector<8x32xbf16>, vector<32x32xbf16>, vector<8x32xf32> -> vector<8x32xf32>
    %c0_18 = arith.constant 0 : index
    %c0_19 = arith.constant 0 : index
    %51 = vector.load %arg12[%c0_18, %c0_19] : memref<1x32xf32, #tpu.memory_space<vmem>>, vector<1x32xf32>
    %52 = vector.broadcast %51 : vector<1x32xf32> to vector<8x32xf32>
    %53 = arith.addf %50, %52 : vector<8x32xf32>
    %54 = arith.addf %7, %53 : vector<8x32xf32>
    %c0_20 = arith.constant 0 : index
    %c0_21 = arith.constant 0 : index
    %55 = vector.load %arg13[%c0_20, %c0_21] : memref<1x32xf32, #tpu.memory_space<vmem>>, vector<1x32xf32>
    %c0_22 = arith.constant 0 : index
    %c0_23 = arith.constant 0 : index
    %56 = vector.load %arg14[%c0_22, %c0_23] : memref<1x32xf32, #tpu.memory_space<vmem>>, vector<1x32xf32>
    %cst_24 = arith.constant dense<0.000000e+00> : vector<8xf32>
    %57 = vector.multi_reduction <add>, %54, %cst_24 [1] : vector<8x32xf32> to vector<8xf32>
    %58 = vector.shape_cast %57 : vector<8xf32> to vector<8x1xf32>
    %cst_25 = arith.constant 3.200000e+01 : f32
    %59 = vector.broadcast %cst_25 : f32 to vector<8x1xf32>
    %60 = arith.divf %58, %59 : vector<8x1xf32>
    %61 = vector.broadcast %60 : vector<8x1xf32> to vector<8x32xf32>
    %62 = arith.subf %54, %61 : vector<8x32xf32>
    %63 = arith.mulf %62, %62 : vector<8x32xf32>
    %cst_26 = arith.constant dense<0.000000e+00> : vector<8xf32>
    %64 = vector.multi_reduction <add>, %63, %cst_26 [1] : vector<8x32xf32> to vector<8xf32>
    %65 = vector.shape_cast %64 : vector<8xf32> to vector<8x1xf32>
    %cst_27 = arith.constant 3.200000e+01 : f32
    %66 = vector.broadcast %cst_27 : f32 to vector<8x1xf32>
    %67 = arith.divf %65, %66 : vector<8x1xf32>
    %cst_28 = arith.constant 9.99999974E-6 : f32
    %68 = vector.broadcast %cst_28 : f32 to vector<8x1xf32>
    %69 = arith.addf %67, %68 : vector<8x1xf32>
    %70 = math.rsqrt %69 : vector<8x1xf32>
    %71 = vector.broadcast %70 : vector<8x1xf32> to vector<8x32xf32>
    %72 = arith.mulf %62, %71 : vector<8x32xf32>
    %73 = vector.broadcast %55 : vector<1x32xf32> to vector<8x32xf32>
    %74 = arith.mulf %72, %73 : vector<8x32xf32>
    %75 = vector.broadcast %56 : vector<1x32xf32> to vector<8x32xf32>
    %76 = arith.addf %74, %75 : vector<8x32xf32>
    %77 = arith.truncf %76 : vector<8x32xf32> to vector<8x32xbf16>
    %c0_29 = arith.constant 0 : index
    %c0_30 = arith.constant 0 : index
    %78 = vector.load %arg15[%c0_29, %c0_30] : memref<32x128xbf16, #tpu.memory_space<vmem>>, vector<32x128xbf16>
    %cst_31 = arith.constant dense<0.000000e+00> : vector<8x128xf32>
    %79 = tpu.matmul %77, %78, %cst_31 {dimension_numbers = #tpu.dot_dimension_numbers<[1], [0], [0], [1], [0, 0, 1, 1], [], []>} : vector<8x32xbf16>, vector<32x128xbf16>, vector<8x128xf32> -> vector<8x128xf32>
    %c0_32 = arith.constant 0 : index
    %c0_33 = arith.constant 0 : index
    %80 = vector.load %arg16[%c0_32, %c0_33] : memref<1x128xf32, #tpu.memory_space<vmem>>, vector<1x128xf32>
    %81 = vector.broadcast %80 : vector<1x128xf32> to vector<8x128xf32>
    %82 = arith.addf %79, %81 : vector<8x128xf32>
    %83 = arith.mulf %82, %82 : vector<8x128xf32>
    %84 = arith.mulf %82, %83 : vector<8x128xf32>
    %cst_34 = arith.constant 4.471500e-02 : f32
    %85 = vector.broadcast %cst_34 : f32 to vector<8x128xf32>
    %86 = arith.mulf %85, %84 : vector<8x128xf32>
    %87 = arith.addf %82, %86 : vector<8x128xf32>
    %cst_35 = arith.constant 0.797884583 : f32
    %88 = vector.broadcast %cst_35 : f32 to vector<8x128xf32>
    %89 = arith.mulf %88, %87 : vector<8x128xf32>
    %90 = math.tanh %89 : vector<8x128xf32>
    %cst_36 = arith.constant 1.000000e+00 : f32
    %91 = vector.broadcast %cst_36 : f32 to vector<8x128xf32>
    %92 = arith.addf %91, %90 : vector<8x128xf32>
    %cst_37 = arith.constant 5.000000e-01 : f32
    %93 = vector.broadcast %cst_37 : f32 to vector<8x128xf32>
    %94 = arith.mulf %93, %92 : vector<8x128xf32>
    %95 = arith.mulf %82, %94 : vector<8x128xf32>
    %96 = arith.truncf %95 : vector<8x128xf32> to vector<8x128xbf16>
    %c0_38 = arith.constant 0 : index
    %c0_39 = arith.constant 0 : index
    %97 = vector.load %arg17[%c0_38, %c0_39] : memref<128x32xbf16, #tpu.memory_space<vmem>>, vector<128x32xbf16>
    %cst_40 = arith.constant dense<0.000000e+00> : vector<8x32xf32>
    %98 = tpu.matmul %96, %97, %cst_40 {dimension_numbers = #tpu.dot_dimension_numbers<[1], [0], [0], [1], [0, 0, 1, 1], [], []>} : vector<8x128xbf16>, vector<128x32xbf16>, vector<8x32xf32> -> vector<8x32xf32>
    %c0_41 = arith.constant 0 : index
    %c0_42 = arith.constant 0 : index
    %99 = vector.load %arg18[%c0_41, %c0_42] : memref<1x32xf32, #tpu.memory_space<vmem>>, vector<1x32xf32>
    %100 = vector.broadcast %99 : vector<1x32xf32> to vector<8x32xf32>
    %101 = arith.addf %98, %100 : vector<8x32xf32>
    %102 = arith.addf %54, %101 : vector<8x32xf32>
    %c0_43 = arith.constant 0 : index
    %c0_44 = arith.constant 0 : index
    %c0_45 = arith.constant 0 : index
    %103 = vector.load %arg19[%c0_43, %c0_44, %c0_45] : memref<1x8x32xf32, #tpu.memory_space<vmem>>, vector<1x8x32xf32>
    %104 = vector.shape_cast %103 : vector<1x8x32xf32> to vector<8x32xf32>
    %105 = vector.shape_cast %102 : vector<8x32xf32> to vector<1x8x32xf32>
    tpu.vector_store %arg19[%c0_43, %c0_44, %c0_45], %105 {strides = array<i32>} : memref<1x8x32xf32, #tpu.memory_space<vmem>>, vector<1x8x32xf32>,
    return
  }
  func.func @transform_0(%arg0: i32, %arg1: i32) -> (i32, i32, i32) {
    %c0_i32 = arith.constant 0 : i32
    %c0_i32_0 = arith.constant 0 : i32
    %c0_i32_1 = arith.constant 0 : i32
    return %arg0, %c0_i32, %c0_i32_0 : i32, i32, i32
  }
  func.func @transform_1(%arg0: i32, %arg1: i32) -> (i32, i32) {
    %c0_i32 = arith.constant 0 : i32
    %c0_i32_0 = arith.constant 0 : i32
    %c0_i32_1 = arith.constant 0 : i32
    return %c0_i32, %c0_i32_0 : i32, i32
  }
  func.func @transform_2(%arg0: i32, %arg1: i32) -> (i32, i32) {
    %c0_i32 = arith.constant 0 : i32
    %c0_i32_0 = arith.constant 0 : i32
    %c0_i32_1 = arith.constant 0 : i32
    return %c0_i32, %c0_i32_0 : i32, i32
  }
  func.func @transform_3(%arg0: i32, %arg1: i32) -> (i32, i32) {
    %c0_i32 = arith.constant 0 : i32
    %c0_i32_0 = arith.constant 0 : i32
    %c0_i32_1 = arith.constant 0 : i32
    return %c0_i32, %c0_i32_0 : i32, i32
  }
  func.func @transform_4(%arg0: i32, %arg1: i32) -> (i32, i32) {
    %c0_i32 = arith.constant 0 : i32
    %c0_i32_0 = arith.constant 0 : i32
    %c0_i32_1 = arith.constant 0 : i32
    return %c0_i32, %c0_i32_0 : i32, i32
  }
  func.func @transform_5(%arg0: i32, %arg1: i32) -> (i32, i32) {
    %c0_i32 = arith.constant 0 : i32
    %c0_i32_0 = arith.constant 0 : i32
    %c0_i32_1 = arith.constant 0 : i32
    return %c0_i32, %c0_i32_0 : i32, i32
  }
  func.func @transform_6(%arg0: i32, %arg1: i32) -> (i32, i32) {
    %c0_i32 = arith.constant 0 : i32
    %c0_i32_0 = arith.constant 0 : i32
    %c0_i32_1 = arith.constant 0 : i32
    return %c0_i32, %c0_i32_0 : i32, i32
  }
  func.func @transform_7(%arg0: i32, %arg1: i32) -> (i32, i32) {
    %c0_i32 = arith.constant 0 : i32
    %c0_i32_0 = arith.constant 0 : i32
    %c0_i32_1 = arith.constant 0 : i32
    return %c0_i32, %c0_i32_0 : i32, i32
  }
  func.func @transform_8(%arg0: i32, %arg1: i32) -> (i32, i32) {
    %c0_i32 = arith.constant 0 : i32
    %c0_i32_0 = arith.constant 0 : i32
    %c0_i32_1 = arith.constant 0 : i32
    return %c0_i32, %c0_i32_0 : i32, i32
  }
  func.func @transform_9(%arg0: i32, %arg1: i32) -> (i32, i32) {
    %c0_i32 = arith.constant 0 : i32
    %c0_i32_0 = arith.constant 0 : i32
    %c0_i32_1 = arith.constant 0 : i32
    return %c0_i32, %c0_i32_0 : i32, i32
  }
  func.func @transform_10(%arg0: i32, %arg1: i32) -> (i32, i32) {
    %c0_i32 = arith.constant 0 : i32
    %c0_i32_0 = arith.constant 0 : i32
    %c0_i32_1 = arith.constant 0 : i32
    return %c0_i32, %c0_i32_0 : i32, i32
  }
  func.func @transform_11(%arg0: i32, %arg1: i32) -> (i32, i32) {
    %c0_i32 = arith.constant 0 : i32
    %c0_i32_0 = arith.constant 0 : i32
    %c0_i32_1 = arith.constant 0 : i32
    return %c0_i32, %c0_i32_0 : i32, i32
  }
  func.func @transform_12(%arg0: i32, %arg1: i32) -> (i32, i32) {
    %c0_i32 = arith.constant 0 : i32
    %c0_i32_0 = arith.constant 0 : i32
    %c0_i32_1 = arith.constant 0 : i32
    return %c0_i32, %c0_i32_0 : i32, i32
  }
  func.func @transform_13(%arg0: i32, %arg1: i32) -> (i32, i32) {
    %c0_i32 = arith.constant 0 : i32
    %c0_i32_0 = arith.constant 0 : i32
    %c0_i32_1 = arith.constant 0 : i32
    return %c0_i32, %c0_i32_0 : i32, i32
  }
  func.func @transform_14(%arg0: i32, %arg1: i32) -> (i32, i32) {
    %c0_i32 = arith.constant 0 : i32
    %c0_i32_0 = arith.constant 0 : i32
    %c0_i32_1 = arith.constant 0 : i32
    return %c0_i32, %c0_i32_0 : i32, i32
  }
  func.func @transform_15(%arg0: i32, %arg1: i32) -> (i32, i32) {
    %c0_i32 = arith.constant 0 : i32
    %c0_i32_0 = arith.constant 0 : i32
    %c0_i32_1 = arith.constant 0 : i32
    return %c0_i32, %c0_i32_0 : i32, i32
  }
  func.func @transform_16(%arg0: i32, %arg1: i32) -> (i32, i32) {
    %c0_i32 = arith.constant 0 : i32
    %c0_i32_0 = arith.constant 0 : i32
    %c0_i32_1 = arith.constant 0 : i32
    return %c0_i32, %c0_i32_0 : i32, i32
  }
  func.func @transform_17(%arg0: i32, %arg1: i32) -> (i32, i32, i32) {
    %c0_i32 = arith.constant 0 : i32
    %c0_i32_0 = arith.constant 0 : i32
    return %arg0, %arg1, %c0_i32 : i32, i32, i32
  }
  func.func @transform_18(%arg0: i32, %arg1: i32) -> (i32, i32, i32) {
    %c0_i32 = arith.constant 0 : i32
    %c0_i32_0 = arith.constant 0 : i32
    %c0_i32_1 = arith.constant 0 : i32
    return %arg0, %c0_i32, %c0_i32_0 : i32, i32, i32
  }
  func.func @transform_19(%arg0: i32, %arg1: i32) -> (i32, i32, i32) {
    %c0_i32 = arith.constant 0 : i32
    %c0_i32_0 = arith.constant 0 : i32
    %c0_i32_1 = arith.constant 0 : i32
    return %arg0, %c0_i32, %c0_i32_0 : i32, i32, i32
  }
}

</mosaic_0001>

<bundles_post_ra>
// kernel: tpu_custom_call.1
= control target key start
LH: loop header
LB: loop body
LE: loop exit
PB: predicated region body
PF: predicated region fallthrough
CT: control target
= control target key end

     0   :  { %s3125_s0 = inlined_call_operand.vmem [shape: f32[2,8,32], index: 0, kind: input, shape index: {}]   ;;  %s3126_s1 = inlined_call_operand.vmem [shape: f32[1,32], index: 1, kind: input, shape index: {}]   ;;  %s3127_s2 = inlined_call_operand.vmem [shape: f32[1,32], index: 2, kind: input, shape index: {}]   ;;  %s3128_s3 = inlined_call_operand.vmem [shape: bf16[32,32], index: 3, kind: input, shape index: {}]   ;;  %s3129_s4 = inlined_call_operand.hbm [shape: f32[1,32], index: 4, kind: input, shape index: {}]   ;;  %s3130_s5 = inlined_call_operand.vmem [shape: bf16[32,32], index: 5, kind: input, shape index: {}]   ;;  %s3131_s6 = inlined_call_operand.hbm [shape: f32[1,32], index: 6, kind: input, shape index: {}]   ;;  %s3132_s7 = inlined_call_operand.vmem [shape: bf16[32,32], index: 7, kind: input, shape index: {}]   ;;  %s3133_s8 = inlined_call_operand.hbm [shape: f32[1,32], index: 8, kind: input, shape index: {}]   ;;  %s3134_s9 = inlined_call_operand.vmem [shape: bf16[32,32], index: 9, kind: input, shape index: {}]   ;;  %s3135_s10 = inlined_call_operand.vmem [shape: f32[1,32], index: 10, kind: input, shape index: {}]   ;;  %s3136_s11 = inlined_call_operand.vmem [shape: f32[1,32], index: 11, kind: input, shape index: {}]   ;;  %s3137_s12 = inlined_call_operand.vmem [shape: f32[1,32], index: 12, kind: input, shape index: {}]   ;;  %s3138_s13 = inlined_call_operand.vmem [shape: bf16[32,128], index: 13, kind: input, shape index: {}]   ;;  %s3139_s14 = inlined_call_operand.vmem [shape: f32[1,128], index: 14, kind: input, shape index: {}]   ;;  %s3140_s15 = inlined_call_operand.vmem [shape: bf16[128,32], index: 15, kind: input, shape index: {}]   ;;  %s3141_s16 = inlined_call_operand.vmem [shape: f32[1,32], index: 16, kind: input, shape index: {}]   ;;  %s3142_s17 = inlined_call_operand.hbm [shape: f32[2,8,32], index: 17, kind: output, shape index: {0}]   ;;  %s3143_s18 = inlined_call_operand.hbm [shape: f32[2,8,32], index: 18, kind: output, shape index: {1}]   ;;  %s3144_s19 = inlined_call_operand.hbm [shape: f32[2,8,32], index: 19, kind: output, shape index: {2}]  }
   0x1   :  { %3160 = sst [smem:[#allocation26_spill]] %s3125_s0 }
   0x2   :  { %3161 = sst [smem:[#allocation27_spill]] %s3126_s1 }
   0x3   :  { %3162 = sst [smem:[#allocation28_spill]] %s3127_s2 }
   0x4   :  { %3163 = sst [smem:[#allocation29_spill]] %s3128_s3 }
   0x5   :  { %3164 = sst [smem:[#allocation30_spill]] %s3131_s6 }
   0x6   :  { %3165 = sst [smem:[#allocation31_spill]] %s3141_s16 }
   0x7   :  { %3166 = sst [smem:[#allocation32_spill]] %s3142_s17 }
   0x8   :  { %3167 = sst [smem:[#allocation33_spill]] %s3144_s19 }
   0x9   :  { %25 = vsyncpa [#allocation6], 0 }
   0xa   :  { %26 = vsyncpa [#allocation9], 0 }
   0xb   :  { %27 = vsyncpa [#allocation7], 0 }
   0xc   :  { %29 = vsyncpa [#allocation7 + $0x1], 0 }
   0xd   :  { %30 = vsyncpa [#allocation13], 0 }
   0xe   :  { %32 = vsyncpa [#allocation13 + $0x1], 0  ;;  %s2641_s0 = smov 0   ;;  %s2643_s30 = smov 0  }
   0xf   :  { %s2645_s20 = smov 0   ;;  %s2647_s21 = smov 0  }
  0x10   :  { %s2649_s1 = smov 0   ;;  %s2651_s22 = smov 0  }
  0x11 LB: > { %3168 = sst [smem:[#allocation19_spill]] %s2504_s0  ;;  %s2672_s2 = sadd.s32 4294967295, %s2524_s22   ;;  %s2524_s22 = sphi %s2651_s22, %s38_s22   ;;  %s2520_s1 = sphi %s2649_s1, %s3205_s1   ;;  %s2516_s21 = sphi %s2647_s21, %s3204_s21   ;;  %s2512_s20 = sphi %s2645_s20, %s3203_s20   ;;  %s2508_s30 = sphi %s2643_s30, %s3207_s30   ;;  %s2504_s0 = sphi %s2641_s0, %s3206_s0  }
  0x12   : > { %3169 = sst [smem:[#allocation20_spill]] %s2512_s20  ;;  %s3147_s23 = sadd.s32 4294967294, %s2524_s22  }
  0x13   : > { %3170 = sst [smem:[#allocation21_spill]] %s2520_s1  ;;  %s50_s24 = sadd.s32 1, %s2520_s1 }
  0x14   : > { %3171 = sst [smem:[#allocation22_spill]] %s2524_s22  ;;  %s421_s25 = sadd.s32 1, %s2512_s20 }
  0x15   : > { %p52_p0 = scmp.ge.s32.totalorder %s50_s24, 2  ;;  %p431_p1 = scmp.ne.s32.totalorder %s2512_s20, %s2508_s30 }
  0x16   : > { %p432_p2 = scmp.eq.s32.totalorder %s2672_s2, 1  ;;  %p437_p3 = scmp.ne.s32.totalorder %s2508_s30, %s2504_s0 }
  0x17   : > { %s3209_s24 = smov (%p52_p0, %s50_s24), 0  ;;  %p438_p5 = scmp.eq.s32.totalorder %s3147_s23, 1 }
  0x18   : > { %3172 = sst [smem:[#allocation23_spill]] %s3209_s24  ;;  %p2684_p4 = por %p432_p2, %p431_p1 }
  0x19   : > { %s416_s26 = ssub.s32 %s2520_s1, %s3209_s24  ;;  %p1933_p6 = scmp.ge.s32.totalorder %s2524_s22, 1 }
  0x1a   : > { %s3173_s3 = scalar_select %p2684_p4, 1, 0 }
  0x1b   : > { %p419_p7 = scmp.eq.s32.totalorder %s416_s26, 0  ;;  %p2693_p8 = por %p438_p5, %p437_p3 }
  0x1c   : > { %p497_p9 = scmp.lt.s32.totalorder %s2524_s22, 3  ;;  %p3155_p11 = scmp.eq.s32.totalorder %s2672_s2, 0 }
  0x1d   : > { %s3174_s27 = scalar_select %p2693_p8, 1, 0 }
  0x1e   : > { %s2699_s28 = scalar_select %p419_p7, %s2512_s20, %s421_s25  }
  0x1f   : > { %3175 = sst [smem:[#allocation24_spill]] %s3174_s27  ;;  %p2701_p10 = pnand %p1933_p6, %p497_p9 }
  0x20   : > { %3176 = sst [smem:[#allocation25_spill]] %s2699_s28  ;;  %s2526_s0 = smov [#allocation8]  }
  0x21   : > { %s3177_s29 = scalar_select %p2701_p10, 1, 0 }
  0x22   : > { %p2167_p12 = pneg %p2701_p10  ;;  %s533_s23 = sshll.u32 %s2526_s0, 4  ;;  %s534_s23 = int_to_ptr.vmem [resolvable:$true] %s533_s23 }
  0x23   : > { %s2527_s24 = smov [#allocation5]   ;;  %s3179_s6 = sld [smem:[#allocation30_spill]] }
  0x24   : > { %p2710_p13 = pnand %p3155_p11, %p2167_p12  ;;  %s519_s25 = sshll.u32 %s2527_s24, 4  ;;  %s2714_s25 = int_to_ptr.vmem [resolvable:$true] %s519_s25 }
  0x26   : > { %p2724_p1 = pneg %p2710_p13 }
  0x29   : > { %s2294_s20 = scalar_lea.hbm %s3179_s6, 16 }
  0x2a   : > { %p2295_p0 = scmp.ne.s32.totalorder %s3179_s6, %s2294_s20  ;;  %p2301_p5 = scmp.lt.u32.totalorder %s2294_s20, %s3179_s6 }
  0x2c   : > { %p2297_p2 = pnand %p2724_p1, %p2295_p0 }
  0x2e   : > { %p2298_p3 = pneg %p2297_p2 }
  0x30   : > { %p2303_p6 = pnand %p2301_p5, %p2298_p3 }
  0x32   : > { %2306 = shalt.err (!%p2303_p6)
}
  0x33   : > { %s2307_s1 = scalar_lea.vmem %s534_s23, 16  ;;  %s2314_s22 = scalar_lea.vmem %s534_s23, 32 }
  0x34   : > { %p2308_p7 = scmp.ne.s32.totalorder %s534_s23, %s2307_s1  ;;  %p2315_p11 = scmp.lt.s32.totalorder %s534_s23, %s534_s23 }
  0x35   : > { %p2316_p8 = scmp.lt.s32.totalorder %s2314_s22, %s2307_s1 }
  0x36   : > { %p2310_p9 = pnand %p2308_p7, %p2724_p1 }
  0x37   : > { %p2317_p4 = por %p2316_p8, %p2315_p11 }
  0x38   : > { %p2311_p12 = pneg %p2310_p9 }
  0x3a   : > { %p2318_p10 = pnand %p2317_p4, %p2311_p12 }
  0x3c   : > { %2321 = shalt.err (!%p2318_p10)
}
  0x3d   : > { %2173 = dma.hbm_to_vmem [thread:$0]  (!%p2710_p13), %s3179_s6, 16, %s534_s23, [#allocation9]  }
  0x3e   : > { %s2322_s24 = scalar_lea.hbm %s3129_s4, 16 }
  0x3f   : > { %p2323_p0 = scmp.ne.s32.totalorder %s3129_s4, %s2322_s24  ;;  %p2329_p4 = scmp.lt.u32.totalorder %s2322_s24, %s3129_s4 }
  0x41   : > { %p2325_p2 = pnand %p2323_p0, %p2724_p1 }
  0x43   : > { %p2326_p8 = pneg %p2325_p2 }
  0x45   : > { %p2331_p10 = pnand %p2329_p4, %p2326_p8 }
  0x47   : > { %2334 = shalt.err (!%p2331_p10)
}
  0x48   : > { %s2335_s23 = scalar_lea.vmem %s2714_s25, 16  ;;  %s2342_s16 = scalar_lea.vmem %s2714_s25, 32 }
  0x49   : > { %p2336_p11 = scmp.ne.s32.totalorder %s2714_s25, %s2335_s23  ;;  %p2343_p6 = scmp.lt.s32.totalorder %s2714_s25, %s2714_s25 }
  0x4a   : > { %p2344_p7 = scmp.lt.s32.totalorder %s2342_s16, %s2335_s23 }
  0x4b   : > { %p2338_p3 = pnand %p2336_p11, %p2724_p1 }
  0x4c   : > { %p2345_p9 = por %p2344_p7, %p2343_p6 }
  0x4d   : > { %p2339_p5 = pneg %p2338_p3 }
  0x4f   : > { %p2346_p12 = pnand %p2345_p9, %p2339_p5 }
  0x51   : > { %2349 = shalt.err (!%p2346_p12)
}
  0x52   : > { %2170 = dma.hbm_to_vmem [thread:$0]  (!%p2710_p13), %s3129_s4, 16, %s2714_s25, [#allocation6]  }
  0x53   : > { %s2528_s28 = smov [#allocation10]   ;;  %s2350_s1 = scalar_lea.hbm %s3133_s8, 16 }
  0x54   : > { %s547_s17 = sshll.u32 %s2528_s28, 4  ;;  %p2351_p0 = scmp.ne.s32.totalorder %s3133_s8, %s2350_s1  ;;  %s548_s17 = int_to_ptr.vmem [resolvable:$true] %s547_s17 }
  0x55   : > { %p2357_p4 = scmp.lt.u32.totalorder %s2350_s1, %s3133_s8 }
  0x56   : > { %p2353_p2 = pnand %p2351_p0, %p2724_p1 }
  0x58   : > { %p2354_p8 = pneg %p2353_p2 }
  0x5a   : > { %p2359_p10 = pnand %p2357_p4, %p2354_p8 }
  0x5c   : > { %2362 = shalt.err (!%p2359_p10)
}
  0x5d   : > { %s2363_s25 = scalar_lea.vmem %s548_s17, 16  ;;  %s2370_s19 = scalar_lea.vmem %s548_s17, 32 }
  0x5e   : > { %p2364_p11 = scmp.ne.s32.totalorder %s548_s17, %s2363_s25  ;;  %p2371_p6 = scmp.lt.s32.totalorder %s548_s17, %s548_s17 }
  0x5f   : > { %p2372_p7 = scmp.lt.s32.totalorder %s2370_s19, %s2363_s25 }
  0x60   : > { %p2366_p3 = pnand %p2364_p11, %p2724_p1 }
  0x61   : > { %p2373_p9 = por %p2372_p7, %p2371_p6 }
  0x62   : > { %p2367_p5 = pneg %p2366_p3 }
  0x64   : > { %p2374_p12 = pnand %p2373_p9, %p2367_p5 }
  0x66   : > { %2377 = shalt.err (!%p2374_p12)
}
  0x67   : > { %2176 = dma.hbm_to_vmem [thread:$0]  (!%p2710_p13), %s3133_s8, 16, %s548_s17, [#allocation9]  }
  0x68   : > { %p3181_p0 = scmp.ne.s32.totalorder %s3177_s29, 0 }
  0x69   : > { %p3182_p2 = scmp.eq.s32.totalorder (!%p3181_p0), %s2672_s2, 0 }
  0x6a   : > { %591 = sbr.rel (%p3181_p0) target bundleno = 2714 (0xa9a), region = 88 }
  0x71   : > { %2487 = dma.done.wait (%p3182_p2), [#allocation6], 16   ;;  %p3183_p1 = pmov %p3182_p2 }
  0x73   : > { %2489 = vsyncadd (%p3183_p1), [#allocation6], 4294967280  ;;  %p3184_p8 = pmov %p3183_p1 }
  0x74   : > { %p3185_p4 = pmov %p3183_p1 }
  0x75   : > { %2491 = dma.done.wait (%p3184_p8), [#allocation9], 32  }
  0x76   : > { %2493 = vsyncadd (%p3185_p4), [#allocation9], 4294967264  ;;  %p664_p10 = scmp.lt.s32.totalorder %s2516_s21, 1  ;;  %s3186_s17 = sld [smem:[#allocation26_spill]]  ;;  %vm676_vm0 = vcmask 261120   ;;  %v2529_v8 = vmov 0.0  }
  0x77   : > { %s3187_s22 = sld [smem:[#allocation29_spill]]  ;;  %2041 = vmatprep.subr.bf16.mxu0 %v2529_v8  ;;  %vm2530_vm1 = vmmov 0   ;;  %2065 = vmatprep.subr.bf16.mxu1 %v2529_v8  ;;  %s3189_s28 = sld [smem:[#allocation27_spill]]  ;;  %v2256_v19 = vld [vmem:[%s3130_s5] sm:$0xff]   ;;  %v2257_v21 = vld [vmem:[%s3130_s5 + $0x8] sm:$0xff]   ;;  %vm902_vm2 = vcmask 60416  }
  0x78   : > { %s665_s6 = scalar_select %p664_p10, %s2516_s21, 1  ;;  %2045 = vmatprep.mubr.msk.bf16.mxu0 %vm2530_vm1, %v2529_v8  ;;  %2067 = vmatprep.mubr.msk.bf16.mxu1 %vm2530_vm1, %v2529_v8  ;;  %v2258_v22 = vld [vmem:[%s3132_s7] sm:$0xff]   ;;  %v2259_v23 = vld [vmem:[%s3132_s7 + $0x8] sm:$0xff]   ;;  %v1948_v24 = vld [vmem:[#allocation5] ss:$0 sm:$0xff]  ;;  %vm985_vm3 = vcmask 64512  }
  0x79   : > { %s3190_s0 = sld [smem:[#allocation28_spill]]  ;;  %s3159_s19 = sand.u32 1, %s2508_s30   ;;  %v1952_v32 = vld [vmem:[#allocation8] ss:$0 sm:$0xff]  ;;  %v1956_v39 = vld [vmem:[#allocation10] ss:$0 sm:$0xff] }
  0x7a   : > { %s1945_s26 = sshll.u32 %s665_s6, 3  ;;  %s2851_s27 = sshll.u32 %s3159_s19, 3  ;;  %vm1225_vm4 = vcmask 1043456   ;;  %vm1423_vm6 = vcmask 130048   ;;  %vm1426_vm7 = vcmask 195584  }
  0x7b   : > { %s656_s6 = scalar_lea.vmem [#allocation12], %s2851_s27  ;;  %s2533_s29 = smov 104  }
  0x7c   : > { %s667_s20 = scalar_lea.vmem %s3186_s17, %s1945_s26  ;;  %s2532_s26 = smov 112  }
  0x7d   : > { %v2797_v0 = vld [vmem:[%s667_s20] sm:$0xff]  ;;  %s3188_s23 = smov %s3187_s22  ;;  %s2536_s16 = smov 8  }
  0x7e   : > { %v677_v1 = vsel %vm676_vm0, %v2797_v0, 0.0  ;;  %v2254_v7 = vld [vmem:[%s3187_s22] sm:$0xff]   ;;  %v2255_v9 = vld [vmem:[%s3188_s23 + $0x8] sm:$0xff]   ;;  %s2535_s22 = smov 16   ;;  %s2537_s25 = smov 24  }
  0x7f   : > { %678 = vadd.xlane.f32.xlu0 %v677_v1  ;;  %2042 = vmatpush3.bf16.msra.mxu0 %v2254_v7  ;;  %v1946_v14 = vld [vmem:[%s3189_s28] ss:$0 sm:$0xff]  ;;  %s2531_s28 = smov 120   ;;  %s1754_s17 = sshll.u32 %s656_s6, 4  ;;  %s1755_s17 = int_to_ptr.vmem [resolvable:$true] %s1754_s17 }
  0x80   : > { %2043 = vmatprep.subr.bf16.mxu0 %v2529_v8  ;;  %v1947_v16 = vld [vmem:[%s3190_s0] ss:$0 sm:$0xff]  ;;  %s663_s0 = scalar_lea.vmem [#allocation14], %s2851_s27  ;;  %s2378_s24 = scalar_lea.vmem %s1755_s17, 128 }
  0x81   : > { %p2379_p13 = scmp.ne.s32.totalorder %s1755_s17, %s2378_s24  ;;  %p3191_p11 = scmp.ne.s32.totalorder %s3173_s3, 0 }
  0x82   : > { %s2538_s1 = smov [#allocation12]  }
  0x83   : > { %2044 = vmatpush3.bf16.msra.mxu0 %v2255_v9  ;;  %p2380_p3 = pnand %p2379_p13, %p3191_p11 }
  0x84   : > { %2049 = vmatprep.subr.bf16.mxu0 %v2529_v8 }
  0x85   : > { %p2381_p5 = pneg %p2380_p3 }
 0x10c   : > { %v679_v2 = vpop.xlane.xlu0 %678 }
 0x10d   : > { %v681_v3 = vmul.f32 0.03125, %v679_v2 }
 0x10f   : > { %v682_v4 = vsub.f32 %v2797_v0, %v681_v3  ;;  %v977_v3 = vlaneseq }
 0x111   : > { %v683_v5 = vmul.f32 %v682_v4, %v682_v4 }
 0x113   : > { %v684_v6 = vsel %vm676_vm0, %v683_v5, 0.0  ;;  %v982_v5 = vand.u32 127, %v977_v3 }
 0x114   : > { %685 = vadd.xlane.f32.xlu0 %v684_v6  ;;  %v2534_v6 = vmov -1e+09  }
 0x1a1   : > { %v686_v10 = vpop.xlane.xlu0 %685 }
 0x1a2   : > { %v687_v11 = vmul.f32 0.03125, %v686_v10 }
 0x1a4   : > { %v688_v12 = vadd.f32 1e-05, %v687_v11 }
 0x1a6   : > { %2272 = vrsqrt.f32 %v688_v12 }
 0x1b0   : > { %v2273_v13 = vpop.eup %2272 }
 0x1b1   : > { %v690_v15 = vmul.f32 %v2273_v13, %v682_v4  ;;  %v978_v4 = vshrl.u32 %v977_v3, 7 }
 0x1b3   : > { %v697_v17 = vmul.f32 %v1946_v14, %v690_v15  ;;  %vm983_vm5 = vcmp.le.s32.totalorder %v982_v5, %v978_v4 }
 0x1b4   : > { %v984_v7 = vsel %vm983_vm5, 0.0, %v2534_v6 }
 0x1b5   : > { %v704_v18 = vadd.f32 %v1947_v16, %v697_v17 }
 0x1b7   : > { %v705_v20 = vpack.c.bf16 %v704_v18, %v704_v18 }
 0x1b9   : > { %2046 = vmatmul.mubr.msk.bf16.vlgmr.msra.gmra.mrb[0].mxu0 %vm676_vm0, %v705_v20 }
 0x1ba   : > { %2050 = vmatpush3.bf16.msra.mxu0 %v2256_v19  ;;  %2053 = vmatprep.mubr.msk.bf16.mxu0 %vm2530_vm1, %v2529_v8 }
 0x1bb   : > { %2051 = vmatprep.subr.bf16.mxu0 %v2529_v8 }
 0x1be   : > { %2052 = vmatpush3.bf16.msra.mxu0 %v2257_v21 }
 0x1bf   : > { %2057 = vmatprep.subr.bf16.mxu0 %v2529_v8 }
 0x1c1   : > { %2054 = vmatmul.mubr.msk.bf16.vlgmr.msra.gmra.mrb[4].mxu0 %vm676_vm0, %v705_v20 }
 0x1c2   : > { %2058 = vmatpush3.bf16.msra.mxu0 %v2258_v22  ;;  %2061 = vmatprep.mubr.msk.bf16.mxu0 %vm2530_vm1, %v2529_v8 }
 0x1c3   : > { %2059 = vmatprep.subr.bf16.mxu0 %v2529_v8 }
 0x1c6   : > { %2060 = vmatpush3.bf16.msra.mxu0 %v2259_v23 }
 0x1c7   : > { %2071 = vmatprep.subr.bf16.mxu0 %v2529_v8 }
 0x1c9   : > { %2062 = vmatmul.mubr.msk.bf16.vlgmr.msra.gmra.mrb[8].mxu0 %vm676_vm0, %v705_v20 }
 0x1ca   : > { %2073 = vmatprep.mubr.msk.bf16.mxu0 %vm2530_vm1, %v2529_v8 }
 0x28c   : > { %v766_v25 = vpop.f32.mrb[0].mxu0 }
 0x28d   : > { %v767_v26 = vadd.f32 %v1948_v24, %v766_v25  ;;  %v2047_v27 = vpop.f32.mrb[1].mxu0 }
 0x28e   : > { %v769_v28 = vpop.f32.mrb[2].mxu0 }
 0x28f   : > { %v900_v29 = vmul.f32 0.35355338, %v767_v26  ;;  %v2048_v30 = vpop.f32.mrb[3].mxu0 }
 0x291   : > { %v901_v31 = vpack.c.bf16 %v900_v29, %v900_v29 }
 0x293   : > { %903 = vst.msk [vmem:[#allocation2] sm:$0xf] %vm902_vm2, %v901_v31  ;;  %911 = vrot.lane.b32.xlu0 %v901_v31, %s2531_s28 }
 0x294   : > { %v829_v33 = vpop.f32.mrb[4].mxu0 }
 0x295   : > { %v830_v34 = vadd.f32 %v1952_v32, %v829_v33  ;;  %v2055_v35 = vpop.f32.mrb[5].mxu0 }
 0x296   : > { %v832_v36 = vpop.f32.mrb[6].mxu0 }
 0x297   : > { %v904_v37 = vpack.c.bf16 %v830_v34, %v830_v34  ;;  %v2056_v38 = vpop.f32.mrb[7].mxu0  ;;  %898 = vst.msk [vmem:[%s656_s6] sm:$0xff] %vm676_vm0, %v830_v34 }
 0x299   : > { %905 = vst.msk [vmem:[#allocation3] sm:$0xf] %vm902_vm2, %v904_v37  ;;  %919 = vrot.lane.b32.xlu1 %v904_v37, %s2531_s28 }
 0x29a   : > { %v969_v48 = vld [vmem:[#allocation2] sm:$0xf] }
 0x29c   : > { %v892_v40 = vpop.f32.mrb[8].mxu0 }
 0x29d   : > { %v893_v41 = vadd.f32 %v1956_v39, %v892_v40  ;;  %937 = vrot.lane.b32.xlu1 %v904_v37, %s2532_s26  ;;  %v2063_v42 = vpop.f32.mrb[9].mxu0 }
 0x29e   : > { %v895_v43 = vpop.f32.mrb[10].mxu0 }
 0x29f   : > { %v2862_v44 = vpack.c.bf16 %v893_v41, %v893_v41  ;;  %v2064_v45 = vpop.f32.mrb[11].mxu0  ;;  %899 = vst.msk [vmem:[%s663_s0] sm:$0xff] %vm676_vm0, %v893_v41 }
 0x2a0   : > { %v973_v46 = vld [vmem:[#allocation3] sm:$0xf] }
 0x2a1   : > { %907 = vst.msk [vmem:[#allocation4] sm:$0xf] %vm902_vm2, %v2862_v44  ;;  %952 = vrot.lane.b32.xlu1 %v904_v37, %s2533_s29  ;;  %v990_v47 = vsel %vm985_vm3, %v973_v46, 0 }
 0x2a2   : > { %2066 = vmatpush3.bf16.xpose.msra.mxu1 %v990_v47 }
 0x2a3   : > { %2077 = vmatprep.subr.bf16.mxu1 %v2529_v8 }
 0x2a5   : > { %932 = vrot.lane.b32.xlu1 %v901_v31, %s2532_s26 }
 0x2a8   : > { %v1218_v62 = vld [vmem:[#allocation4] sm:$0xf] }
 0x2a9   : > { %947 = vrot.lane.b32.xlu1 %v901_v31, %s2533_s29  ;;  %2068 = vmatmul.mubr.msk.bf16.vlgmr.msra.gmra.mrb[0].mxu1 %vm985_vm3, %v969_v48  ;;  %v1227_v1 = vsel %vm1225_vm4, %v1218_v62, 0 }
 0x2aa   : > { %2079 = vmatprep.mubr.msk.bf16.mxu1 %vm2530_vm1, %v2529_v8 }
 0x305   : > { %v912_v49 = vpop.permute.xlu0 %911 }
 0x306   : > { %915 = vst.msk [vmem:[#allocation2 + $0x4] sm:$0xf] %vm902_vm2, %v912_v49 }
 0x30b   : > { %v920_v50 = vpop.permute.xlu1 %919 }
 0x30c   : > { %923 = vst.msk [vmem:[#allocation3 + $0x4] sm:$0xf] %vm902_vm2, %v920_v50 }
 0x30d   : > { %v970_v59 = vld [vmem:[#allocation2 + $0x4] sm:$0xf] }
 0x30f   : > { %v938_v51 = vpop.permute.xlu1 %937 }
 0x310   : > { %941 = vst.msk [vmem:[#allocation3 + $0x8] sm:$0xf] %vm902_vm2, %v938_v51 }
 0x313   : > { %v953_v52 = vpop.permute.xlu1 %952  ;;  %v974_v53 = vld [vmem:[#allocation3 + $0x4] sm:$0xf] }
 0x314   : > { %956 = vst.msk [vmem:[#allocation3 + $0xc] sm:$0xf] %vm902_vm2, %v953_v52  ;;  %v1036_v54 = vsel %vm985_vm3, %v974_v53, 0 }
 0x315   : > { %2072 = vmatpush3.bf16.xpose.msra.mxu0 %v1036_v54 }
 0x316   : > { %2083 = vmatprep.subr.bf16.mxu0 %v2529_v8 }
 0x317   : > { %v933_v55 = vpop.permute.xlu1 %932  ;;  %v975_v56 = vld [vmem:[#allocation3 + $0x8] sm:$0xf] }
 0x318   : > { %936 = vst.msk [vmem:[#allocation2 + $0x8] sm:$0xf] %vm902_vm2, %v933_v55  ;;  %v1082_v57 = vsel %vm985_vm3, %v975_v56, 0 }
 0x319   : > { %2078 = vmatpush3.bf16.xpose.msra.mxu1 %v1082_v57 }
 0x31a   : > { %2089 = vmatprep.subr.bf16.mxu1 %v2529_v8 }
 0x31b   : > { %v948_v58 = vpop.permute.xlu1 %947  ;;  %v976_v60 = vld [vmem:[#allocation3 + $0xc] sm:$0xf] }
 0x31c   : > { %951 = vst.msk [vmem:[#allocation2 + $0xc] sm:$0xf] %vm902_vm2, %v948_v58  ;;  %2074 = vmatmul.mubr.msk.bf16.vlgmr.msra.gmra.mrb[12].mxu0 %vm985_vm3, %v970_v59  ;;  %v1128_v61 = vsel %vm985_vm3, %v976_v60, 0 }
 0x31d   : > { %2084 = vmatpush3.bf16.xpose.msra.mxu0 %v1128_v61  ;;  %2085 = vmatprep.mubr.msk.bf16.mxu0 %vm2530_vm1, %v2529_v8 }
 0x31e   : > { %2095 = vmatprep.subr.bf16.mxu0 %v2529_v8 }
 0x31f   : > { %v971_v63 = vld [vmem:[#allocation2 + $0x8] sm:$0xf] }
 0x320   : > { %2080 = vmatmul.mubr.msk.bf16.vlgmr.msra.gmra.mrb[4].mxu1 %vm985_vm3, %v971_v63 }
 0x321   : > { %2090 = vmatpush3.bf16.msra.mxu1 %v1227_v1  ;;  %2091 = vmatprep.mubr.msk.bf16.mxu1 %vm2530_vm1, %v2529_v8 }
 0x322   : > { %2101 = vmatprep.subr.bf16.mxu1 %v2529_v8 }
 0x323   : > { %v972_v2 = vld [vmem:[#allocation2 + $0xc] sm:$0xf] }
 0x324   : > { %2086 = vmatmul.mubr.msk.bf16.vlgmr.msra.gmra.mrb[16].mxu0 %vm985_vm3, %v972_v2 }
 0x325   : > { %2097 = vmatprep.mubr.msk.bf16.mxu0 %vm2530_vm1, %v2529_v8 }
 0x37c   : > { %v1026_v9 = vpop.f32.mrb[0].mxu1 }
 0x37d   : > { %v1027_v10 = vadd.f32 %v1026_v9, %v984_v7  ;;  %v2069_v11 = vpop.f32.mrb[1].mxu1 }
 0x37e   : > { %v1029_v12 = vpop.f32.mrb[2].mxu1 }
 0x37f   : > { %v2070_v13 = vpop.f32.mrb[3].mxu1  ;;  %v1170_v14 = vsel %vm985_vm3, %v1027_v10, -inf }
 0x380   : > { %1171 = vmax.xlane.f32.xlu1 %v1170_v14 }
 0x3ef   : > { %v1072_v15 = vpop.f32.mrb[12].mxu0 }
 0x3f0   : > { %v1073_v16 = vadd.f32 %v1072_v15, %v984_v7  ;;  %v2075_v17 = vpop.f32.mrb[13].mxu0 }
 0x3f1   : > { %v1075_v18 = vpop.f32.mrb[14].mxu0 }
 0x3f2   : > { %v2076_v19 = vpop.f32.mrb[15].mxu0  ;;  %v1173_v20 = vsel %vm985_vm3, %v1073_v16, -inf }
 0x3f3   : > { %v1118_v21 = vpop.f32.mrb[4].mxu1  ;;  %1174 = vmax.xlane.f32.xlu0 %v1173_v20  ;;  %v2260_v20 = vld [vmem:[%s3134_s9] sm:$0xff]  }
 0x3f4   : > { %v1119_v22 = vadd.f32 %v1118_v21, %v984_v7  ;;  %v2081_v23 = vpop.f32.mrb[5].mxu1  ;;  %v2261_v21 = vld [vmem:[%s3134_s9 + $0x8] sm:$0xff]  }
 0x3f5   : > { %v1121_v24 = vpop.f32.mrb[6].mxu1 }
 0x3f6   : > { %v2082_v25 = vpop.f32.mrb[7].mxu1  ;;  %v1176_v26 = vsel %vm985_vm3, %v1119_v22, -inf }
 0x3f7   : > { %1177 = vmax.xlane.f32.xlu1 %v1176_v26  ;;  %v1164_v27 = vpop.f32.mrb[16].mxu0 }
 0x3f8   : > { %v1165_v28 = vadd.f32 %v1164_v27, %v984_v7  ;;  %v2087_v29 = vpop.f32.mrb[17].mxu0 }
 0x3f9   : > { %v1167_v30 = vpop.f32.mrb[18].mxu0 }
 0x3fa   : > { %v2088_v31 = vpop.f32.mrb[19].mxu0  ;;  %v1179_v32 = vsel %vm985_vm3, %v1165_v28, -inf }
 0x3fb   : > { %1180 = vmax.xlane.f32.xlu1 %v1179_v32 }
 0x40d   : > { %v1172_v33 = vpop.xlane.xlu1 %1171 }
 0x40e   : > { %v1182_v34 = vsub.f32 %v1027_v10, %v1172_v33 }
 0x410   : > { %v1186_v35 = vmul.f32 1.442695, %v1182_v34 }
 0x412   : > { %2274 = vpow2.f32 %v1186_v35 }
 0x41c   : > { %v2275_v36 = vpop.eup %2274 }
 0x41d   : > { %v1194_v37 = vsel %vm985_vm3, %v2275_v36, 0.0 }
 0x41e   : > { %1195 = vadd.xlane.f32.xlu0 %v1194_v37 }
 0x480   : > { %v1175_v38 = vpop.xlane.xlu0 %1174 }
 0x481   : > { %v1183_v39 = vsub.f32 %v1073_v16, %v1175_v38 }
 0x483   : > { %v1188_v40 = vmul.f32 1.442695, %v1183_v39 }
 0x484   : > { %v1178_v41 = vpop.xlane.xlu1 %1177 }
 0x485   : > { %2276 = vpow2.f32 %v1188_v40  ;;  %v1184_v42 = vsub.f32 %v1119_v22, %v1178_v41 }
 0x487   : > { %v1190_v43 = vmul.f32 1.442695, %v1184_v42 }
 0x488   : > { %v1181_v50 = vpop.xlane.xlu1 %1180 }
 0x489   : > { %2278 = vpow2.f32 %v1190_v43  ;;  %v1185_v51 = vsub.f32 %v1165_v28, %v1181_v50 }
 0x48b   : > { %v1192_v52 = vmul.f32 1.442695, %v1185_v51 }
 0x48f   : > { %v2277_v45 = vpop.eup %2276 }
 0x490   : > { %v1197_v46 = vsel %vm985_vm3, %v2277_v45, 0.0 }
 0x491   : > { %1198 = vadd.xlane.f32.xlu1 %v1197_v46 }
 0x493   : > { %v2279_v47 = vpop.eup %2278 }
 0x494   : > { %v1200_v48 = vsel %vm985_vm3, %v2279_v47, 0.0 }
 0x495   : > { %1201 = vadd.xlane.f32.xlu0 %v1200_v48 }
 0x4a2   : > { %942 = vrot.lane.b32.xlu1 %v2862_v44, %s2532_s26 }
 0x4ab   : > { %927 = vrot.lane.b32.xlu0 %v2862_v44, %s2531_s28  ;;  %v1196_v49 = vpop.xlane.xlu0 %1195 }
 0x4ac   : > { %2280 = vrcp.f32 %v1196_v49 }
 0x4ad   : > { %2282 = vpow2.f32 %v1192_v52 }
 0x4b6   : > { %v2281_v53 = vpop.eup %2280 }
 0x4b7   : > { %v1210_v54 = vmul.f32 %v2281_v53, %v2275_v36  ;;  %v2283_v56 = vpop.eup %2282 }
 0x4b8   : > { %v1203_v57 = vsel %vm985_vm3, %v2283_v56, 0.0 }
 0x4b9   : > { %v1214_v55 = vpack.c.bf16 %v1210_v54, %v1210_v54 }
 0x4bb   : > { %2092 = vmatmul.mubr.msk.bf16.vlgmr.msra.gmra.mrb[8].mxu1 %vm985_vm3, %v1214_v55 }
 0x4bc   : > { %2103 = vmatprep.mubr.msk.bf16.mxu1 %vm2530_vm1, %v2529_v8 }
 0x4c6   : > { %1204 = vadd.xlane.f32.xlu1 %v1203_v57 }
 0x4d7   : > { %957 = vrot.lane.b32.xlu1 %v2862_v44, %s2533_s29 }
 0x51e   : > { %v1199_v58 = vpop.xlane.xlu1 %1198 }
 0x51f   : > { %2284 = vrcp.f32 %v1199_v58  ;;  %v2262_v58 = vld [vmem:[%s3138_s13] sm:$0xff]  }
 0x522   : > { %v1202_v59 = vpop.xlane.xlu0 %1201  ;;  %v943_v60 = vpop.permute.xlu1 %942 }
 0x523   : > { %2286 = vrcp.f32 %v1202_v59  ;;  %946 = vst.msk [vmem:[#allocation4 + $0x8] sm:$0xf] %vm902_vm2, %v943_v60 }
 0x526   : > { %v928_v61 = vpop.permute.xlu0 %927 }
 0x527   : > { %931 = vst.msk [vmem:[#allocation4 + $0x4] sm:$0xf] %vm902_vm2, %v928_v61 }
 0x529   : > { %v2285_v62 = vpop.eup %2284 }
 0x52a   : > { %v1220_v63 = vld [vmem:[#allocation4 + $0x8] sm:$0xf]  ;;  %v1211_v3 = vmul.f32 %v2285_v62, %v2277_v45  ;;  %v1971_v45 = vld [vmem:[%s3135_s10] ss:$0 sm:$0xff] }
 0x52b   : > { %v1319_v1 = vsel %vm1225_vm4, %v1220_v63, 0  ;;  %v1975_v63 = vld [vmem:[%s3136_s11] ss:$0 sm:$0xff] }
 0x52c   : > { %2102 = vmatpush3.bf16.msra.mxu1 %v1319_v1  ;;  %v1215_v7 = vpack.c.bf16 %v1211_v3, %v1211_v3 }
 0x52d   : > { %v2287_v2 = vpop.eup %2286  ;;  %2113 = vmatprep.subr.bf16.mxu1 %v2529_v8 }
 0x52e   : > { %v1212_v44 = vmul.f32 %v2287_v2, %v2279_v47  ;;  %v1219_v4 = vld [vmem:[#allocation4 + $0x4] sm:$0xf]  ;;  %v1976_v2 = vld [vmem:[%s3137_s12] ss:$0 sm:$0xff] }
 0x52f   : > { %v1273_v5 = vsel %vm1225_vm4, %v1219_v4, 0 }
 0x530   : > { %2096 = vmatpush3.bf16.msra.mxu0 %v1273_v5  ;;  %v1216_v6 = vpack.c.bf16 %v1212_v44, %v1212_v44  ;;  %v2264_v5 = vld [vmem:[%s3140_s15] sm:$0xff]  }
 0x531   : > { %2107 = vmatprep.subr.bf16.mxu0 %v2529_v8 }
 0x532   : > { %2104 = vmatmul.mubr.msk.bf16.vlgmr.msra.gmra.mrb[12].mxu1 %vm985_vm3, %v1216_v6  ;;  %v2265_v6 = vld [vmem:[%s3140_s15 + $0x8] sm:$0xff]  }
 0x533   : > { %2098 = vmatmul.mubr.msk.bf16.vlgmr.msra.gmra.mrb[20].mxu0 %vm985_vm3, %v1215_v7  ;;  %2117 = vmatprep.mubr.msk.bf16.mxu1 %vm2530_vm1, %v2529_v8  ;;  %v2266_v7 = vld [vmem:[%s3140_s15 + $0x10] sm:$0xff]  }
 0x534   : > { %2109 = vmatprep.mubr.msk.bf16.mxu0 %vm2530_vm1, %v2529_v8  ;;  %2114 = vmatpush3.bf16.msra.mxu1 %v2260_v20 }
 0x535   : > { %2115 = vmatprep.subr.bf16.mxu1 %v2529_v8 }
 0x538   : > { %2116 = vmatpush3.bf16.msra.mxu1 %v2261_v21 }
 0x539   : > { %2129 = vmatprep.subr.bf16.mxu1 %v2529_v8 }
 0x553   : > { %v1205_v9 = vpop.xlane.xlu1 %1204 }
 0x554   : > { %2288 = vrcp.f32 %v1205_v9  ;;  %v2267_v9 = vld [vmem:[%s3140_s15 + $0x18] sm:$0xff]  }
 0x557   : > { %v958_v10 = vpop.permute.xlu1 %957 }
 0x558   : > { %961 = vst.msk [vmem:[#allocation4 + $0xc] sm:$0xf] %vm902_vm2, %v958_v10  ;;  %v2268_v10 = vld [vmem:[%s3140_s15 + $0x20] sm:$0xff]  }
 0x55e   : > { %v2289_v11 = vpop.eup %2288 }
 0x55f   : > { %v1213_v12 = vmul.f32 %v2289_v11, %v2283_v56  ;;  %v1221_v13 = vld [vmem:[#allocation4 + $0xc] sm:$0xf] }
 0x560   : > { %v1365_v14 = vsel %vm1225_vm4, %v1221_v13, 0  ;;  %v2269_v11 = vld [vmem:[%s3140_s15 + $0x28] sm:$0xff]   ;;  %v2271_v13 = vld [vmem:[%s3140_s15 + $0x38] sm:$0xff]  }
 0x561   : > { %2108 = vmatpush3.bf16.msra.mxu0 %v1365_v14  ;;  %v1217_v15 = vpack.c.bf16 %v1213_v12, %v1213_v12  ;;  %v2270_v12 = vld [vmem:[%s3140_s15 + $0x30] sm:$0xff]   ;;  %v1977_v14 = vld [vmem:[%s3139_s14] ss:$0 sm:$0xff] }
 0x562   : > { %2121 = vmatprep.subr.bf16.mxu0 %v2529_v8 }
 0x564   : > { %2110 = vmatmul.mubr.msk.bf16.vlgmr.msra.gmra.mrb[24].mxu0 %vm985_vm3, %v1217_v15 }
 0x565   : > { %2125 = vmatprep.mubr.msk.bf16.mxu0 %vm2530_vm1, %v2529_v8  ;;  %2122 = vmatpush3.bf16.msra.mxu0 %v2262_v58 }
 0x566   : > { %2123 = vmatprep.subr.bf16.mxu0 %v2529_v8 }
 0x58e   : > { %v1263_v16 = vpop.f32.mrb[8].mxu1 }
 0x58f   : > { %v2093_v17 = vpop.f32.mrb[9].mxu1  ;;  %v1407_v38 = vpack.c.bf16 %v1263_v16, %v1263_v16 }
 0x590   : > { %v1266_v18 = vpop.f32.mrb[10].mxu1 }
 0x591   : > { %v2094_v19 = vpop.f32.mrb[11].mxu1 }
 0x605   : > { %v1355_v22 = vpop.f32.mrb[12].mxu1 }
 0x606   : > { %v1409_v23 = vpack.c.bf16 %v1355_v22, %v1355_v22  ;;  %v1309_v24 = vpop.f32.mrb[20].mxu0  ;;  %v2105_v25 = vpop.f32.mrb[13].mxu1 }
 0x607   : > { %v1408_v26 = vpack.c.bf16 %v1309_v24, %v1309_v24  ;;  %v2099_v27 = vpop.f32.mrb[21].mxu0  ;;  %v1358_v28 = vpop.f32.mrb[14].mxu1 }
 0x608   : > { %1415 = vrot.lane.b32.xlu1 %v1409_v23, %s2535_s22  ;;  %v1312_v29 = vpop.f32.mrb[22].mxu0  ;;  %v2106_v30 = vpop.f32.mrb[15].mxu1 }
 0x609   : > { %1412 = vrot.lane.b32.xlu0 %v1408_v26, %s2536_s16  ;;  %v2100_v31 = vpop.f32.mrb[23].mxu0  ;;  %s1721_s16 = sand.u32 1, %s2672_s2   ;;  %s2382_s2 = sshll.u32 %s2538_s1, 4  ;;  %s2383_s2 = int_to_ptr.vmem [resolvable:$false] %s2382_s2 }
 0x60a   : > { %s3018_s20 = scalar_lea.sflag [#allocation13], %s1721_s16  ;;  %p2385_p6 = scmp.lt.s32.totalorder %s1755_s17, %s2383_s2 }
 0x637   : > { %v1401_v32 = vpop.f32.mrb[24].mxu0 }
 0x638   : > { %v1410_v33 = vpack.c.bf16 %v1401_v32, %v1401_v32  ;;  %v2111_v34 = vpop.f32.mrb[25].mxu0 }
 0x639   : > { %v1404_v35 = vpop.f32.mrb[26].mxu0 }
 0x63a   : > { %1418 = vrot.lane.b32.xlu0 %v1410_v33, %s2537_s25  ;;  %v2112_v36 = vpop.f32.mrb[27].mxu0  ;;  %s3008_s25 = sshll.u32 %s2516_s21, 7  ;;  %s2384_s21 = scalar_lea.vmem %s2383_s2, 256 }
 0x63b   : > { %s3014_s29 = scalar_lea.hbm %s3143_s18, %s3008_s25  ;;  %p2386_p7 = scmp.lt.s32.totalorder %s2384_s21, %s2378_s24 }
 0x63d   : > { %p2387_p9 = por %p2386_p7, %p2385_p6 }
 0x63f   : > { %p2388_p12 = pnand %p2387_p9, %p2381_p5 }
 0x67a   : > { %v1416_v40 = vpop.permute.xlu1 %1415 }
 0x67b   : > { %v1413_v37 = vpop.permute.xlu0 %1412 }
 0x67c   : > { %v1422_v39 = vsel %vm985_vm3, %v1407_v38, %v1413_v37 }
 0x67d   : > { %v1425_v41 = vsel %vm1423_vm6, %v1422_v39, %v1416_v40 }
 0x6ac   : > { %v1419_v42 = vpop.permute.xlu0 %1418 }
 0x6ad   : > { %v1428_v43 = vsel %vm1426_vm7, %v1425_v41, %v1419_v42 }
 0x6ae   : > { %2118 = vmatmul.mubr.msk.bf16.vlgmr.msra.gmra.mrb[16].mxu1 %vm676_vm0, %v1428_v43 }
 0x6af   : > { %2145 = vmatprep.mubr.msk.bf16.mxu1 %vm2530_vm1, %v2529_v8  ;;  %2130 = vmatpush3.bf16.msra.mxu1 %v2264_v5 }
 0x6b0   : > { %2131 = vmatprep.subr.bf16.mxu1 %v2529_v8 }
 0x6b3   : > { %2132 = vmatpush3.bf16.msra.mxu1 %v2265_v6 }
 0x6b4   : > { %2133 = vmatprep.subr.bf16.mxu1 %v2529_v8 }
 0x6b7   : > { %2134 = vmatpush3.bf16.msra.mxu1 %v2266_v7 }
 0x6b8   : > { %2135 = vmatprep.subr.bf16.mxu1 %v2529_v8 }
 0x6bb   : > { %2136 = vmatpush3.bf16.msra.mxu1 %v2267_v9 }
 0x6bc   : > { %2137 = vmatprep.subr.bf16.mxu1 %v2529_v8 }
 0x6bf   : > { %2138 = vmatpush3.bf16.msra.mxu1 %v2268_v10 }
 0x6c0   : > { %2139 = vmatprep.subr.bf16.mxu1 %v2529_v8 }
 0x6c3   : > { %2140 = vmatpush3.bf16.msra.mxu1 %v2269_v11 }
 0x6c4   : > { %2141 = vmatprep.subr.bf16.mxu1 %v2529_v8 }
 0x6c7   : > { %2142 = vmatpush3.bf16.msra.mxu1 %v2270_v12 }
 0x6c8   : > { %2143 = vmatprep.subr.bf16.mxu1 %v2529_v8 }
 0x6cb   : > { %2144 = vmatpush3.bf16.msra.mxu1 %v2271_v13 }
 0x781   : > { %v1489_v46 = vpop.f32.mrb[16].mxu1 }
 0x782   : > { %v1490_v47 = vadd.f32 %v1971_v45, %v1489_v46  ;;  %v2119_v48 = vpop.f32.mrb[17].mxu1 }
 0x783   : > { %v1492_v49 = vpop.f32.mrb[18].mxu1 }
 0x784   : > { %v2952_v50 = vadd.f32 %v1490_v47, %v2797_v0  ;;  %v2120_v51 = vpop.f32.mrb[19].mxu1  ;;  %v2263_v0 = vld [vmem:[%s3138_s13 + $0x8] sm:$0xff]  }
 0x785   : > { %2124 = vmatpush3.bf16.msra.mxu0 %v2263_v0 }
 0x786   : > { %v1498_v52 = vsel %vm676_vm0, %v2952_v50, 0.0 }
 0x787   : > { %1499 = vadd.xlane.f32.xlu1 %v1498_v52 }
 0x814   : > { %v1500_v53 = vpop.xlane.xlu1 %1499 }
 0x815   : > { %v1502_v54 = vmul.f32 0.03125, %v1500_v53 }
 0x817   : > { %v1503_v55 = vsub.f32 %v2952_v50, %v1502_v54 }
 0x819   : > { %v1504_v56 = vmul.f32 %v1503_v55, %v1503_v55 }
 0x81b   : > { %v1505_v57 = vsel %vm676_vm0, %v1504_v56, 0.0 }
 0x81c   : > { %1506 = vadd.xlane.f32.xlu0 %v1505_v57 }
 0x8a9   : > { %v1507_v59 = vpop.xlane.xlu0 %1506 }
 0x8aa   : > { %v1508_v60 = vmul.f32 0.03125, %v1507_v59 }
 0x8ac   : > { %v1509_v61 = vadd.f32 1e-05, %v1508_v60 }
 0x8ae   : > { %2290 = vrsqrt.f32 %v1509_v61 }
 0x8b8   : > { %v2291_v62 = vpop.eup %2290 }
 0x8b9   : > { %v1511_v1 = vmul.f32 %v2291_v62, %v1503_v55 }
 0x8bb   : > { %v1518_v3 = vmul.f32 %v1975_v63, %v1511_v1 }
 0x8bd   : > { %v1525_v44 = vadd.f32 %v1976_v2, %v1518_v3 }
 0x8bf   : > { %v1526_v4 = vpack.c.bf16 %v1525_v44, %v1525_v44 }
 0x8c1   : > { %2126 = vmatmul.mubr.msk.bf16.vlgmr.msra.gmra.mrb[28].mxu0 %vm676_vm0, %v1526_v4 }
 0x994   : > { %v1587_v15 = vpop.f32.mrb[28].mxu0 }
 0x995   : > { %v1588_v16 = vadd.f32 %v1977_v14, %v1587_v15  ;;  %v2127_v17 = vpop.f32.mrb[29].mxu0 }
 0x996   : > { %v1590_v18 = vpop.f32.mrb[30].mxu0 }
 0x997   : > { %v1593_v19 = vmul.f32 %v1588_v16, %v1588_v16  ;;  %v2128_v20 = vpop.f32.mrb[31].mxu0 }
 0x999   : > { %v1594_v21 = vmul.f32 %v1593_v19, %v1588_v16 }
 0x99b   : > { %v1595_v22 = vmul.f32 0.044715, %v1594_v21 }
 0x99d   : > { %v1596_v23 = vadd.f32 %v1595_v22, %v1588_v16 }
 0x99f   : > { %v1597_v24 = vmul.f32 0.7978846, %v1596_v23 }
 0x9a1   : > { %2292 = vtanh.f32 %v1597_v24 }
 0x9ab   : > { %v2293_v8 = vpop.eup %2292 }
 0x9ac   : > { %v1599_v25 = vadd.f32 1.0, %v2293_v8 }
 0x9ae   : > { %v1600_v26 = vmul.f32 0.5, %v1599_v25 }
 0x9b0   : > { %v1601_v27 = vmul.f32 %v1600_v26, %v1588_v16 }
 0x9b2   : > { %v1602_v28 = vpack.c.bf16 %v1601_v27, %v1601_v27 }
 0x9b4   : > { %2146 = vmatmul.mubr.bf16.vlgmr.msra.gmra.mrb[20].mxu1 %v1602_v28 }
 0x9b5   : > { %2391 = shalt.err (!%p2388_p12)
}
 0x9b6   : > { %s2392_s6 = scalar_lea.hbm %s3014_s29, 128  ;;  %s2396_s28 = scalar_lea.hbm %s3143_s18, 256 }
 0x9b7   : > { %p2393_p0 = scmp.ne.s32.totalorder %s3014_s29, %s2392_s6  ;;  %p2397_p8 = scmp.lt.u32.totalorder %s3014_s29, %s3143_s18 }
 0x9b8   : > { %p2398_p4 = scmp.lt.u32.totalorder %s2396_s28, %s2392_s6  ;;  %p2400_p13 = scmp.lt.u32.totalorder %s2392_s6, %s3014_s29 }
 0x9b9   : > { %p2394_p2 = pnand %p2393_p0, %p3191_p11 }
 0x9ba   : > { %p2399_p10 = por %p2398_p4, %p2397_p8 }
 0x9bb   : > { %p2395_p1 = pneg %p2394_p2 }
 0x9bc   : > { %p2401_p3 = por %p2400_p13, %p2399_p10 }
 0x9be   : > { %p2402_p5 = pnand %p2401_p3, %p2395_p1 }
 0x9c0   : > { %2405 = shalt.err (!%p2402_p5)
}
 0x9c1   : > { %2162 = dma.vmem_to_hbm [thread:$0]  (%p3191_p11), %s1755_s17, 128, %s3014_s29, %s3018_s20  }
 0x9c2   : > { %s3192_s21 = sld [smem:[#allocation33_spill]]  ;;  %s1767_s28 = sshll.u32 %s663_s0, 4  ;;  %s1768_s28 = int_to_ptr.vmem [resolvable:$true] %s1767_s28 }
 0x9c3   : > { %s2406_s6 = scalar_lea.vmem %s1768_s28, 128  ;;  %s2539_s26 = smov [#allocation14]  }
 0x9c4   : > { %p2407_p6 = scmp.ne.s32.totalorder %s1768_s28, %s2406_s6  ;;  %s2410_s1 = sshll.u32 %s2539_s26, 4  ;;  %s2411_s1 = int_to_ptr.vmem [resolvable:$false] %s2410_s1 }
 0x9c5   : > { %s2412_s19 = scalar_lea.vmem %s2411_s1, 256  ;;  %p2413_p12 = scmp.lt.s32.totalorder %s1768_s28, %s2411_s1 }
 0x9c6   : > { %p2408_p7 = pnand %p2407_p6, %p3191_p11  ;;  %p2414_p0 = scmp.lt.s32.totalorder %s2412_s19, %s2406_s6 }
 0x9c8   : > { %s3193_s16 = smov %s3192_s21  ;;  %s3042_s22 = scalar_lea.hbm %s3192_s21, %s3008_s25 }
 0x9c9   : > { %p2409_p9 = pneg %p2408_p7  ;;  %p2415_p2 = por %p2414_p0, %p2413_p12 }
 0x9cb   : > { %p2416_p1 = pnand %p2415_p2, %p2409_p9 }
 0x9cd   : > { %2419 = shalt.err (!%p2416_p1)
}
 0x9ce   : > { %s2420_s0 = scalar_lea.hbm %s3042_s22, 128  ;;  %s2424_s24 = scalar_lea.hbm %s3193_s16, 256 }
 0x9cf   : > { %p2421_p8 = scmp.ne.s32.totalorder %s3042_s22, %s2420_s0  ;;  %p2425_p13 = scmp.lt.u32.totalorder %s3042_s22, %s3193_s16 }
 0x9d0   : > { %p2426_p3 = scmp.lt.u32.totalorder %s2424_s24, %s2420_s0  ;;  %p2428_p6 = scmp.lt.u32.totalorder %s2420_s0, %s3042_s22 }
 0x9d1   : > { %p2422_p4 = pnand %p2421_p8, %p3191_p11 }
 0x9d2   : > { %p2427_p5 = por %p2426_p3, %p2425_p13 }
 0x9d3   : > { %p2423_p10 = pneg %p2422_p4 }
 0x9d4   : > { %p2429_p7 = por %p2428_p6, %p2427_p5 }
 0x9d6   : > { %p2430_p9 = pnand %p2429_p7, %p2423_p10 }
 0x9d8   : > { %2433 = shalt.err (!%p2430_p9)
}
 0x9d9   : > { %2163 = dma.vmem_to_hbm [thread:$0]  (%p3191_p11), %s1768_s28, 128, %s3042_s22, %s3018_s20  }
 0x9da   : > { %s3194_s26 = sld [smem:[#allocation31_spill]]  ;;  %s649_s1 = scalar_lea.vmem [#allocation11], %s2851_s27 }
 0x9db   : > { %s1741_s29 = sshll.u32 %s649_s1, 4  ;;  %s3195_s24 = sld [smem:[#allocation32_spill]]  ;;  %s3075_s29 = int_to_ptr.vmem [resolvable:$true] %s1741_s29 }
 0x9dc   : > { %s3196_s27 = sand.u32 1, %s2508_s30   ;;  %s2434_s22 = scalar_lea.vmem %s3075_s29, 128 }
 0x9dd   : > { %s1717_s20 = scalar_lea.sflag [#allocation7], %s3196_s27  ;;  %p2435_p12 = scmp.ne.s32.totalorder %s3075_s29, %s2434_s22 }
 0x9de   : > { %s2540_s28 = smov [#allocation11]  }
 0x9df   : > { %p2436_p0 = pnand %p2435_p12, %p3191_p11  ;;  %s2438_s21 = sshll.u32 %s2540_s28, 4  ;;  %s2439_s21 = int_to_ptr.vmem [resolvable:$false] %s2438_s21 }
 0x9e0   : > { %v1981_v29 = vld [vmem:[%s3194_s26] ss:$0 sm:$0xff]  ;;  %s2440_s19 = scalar_lea.vmem %s2439_s21, 256  ;;  %p2441_p1 = scmp.lt.s32.totalorder %s3075_s29, %s2439_s21 }
 0x9e1   : > { %s3073_s2 = scalar_lea.hbm %s3195_s24, %s3008_s25  ;;  %p2437_p2 = pneg %p2436_p0 }
 0x9e2   : > { %p2442_p8 = scmp.lt.s32.totalorder %s2440_s19, %s2434_s22 }
 0x9e4   : > { %p2443_p4 = por %p2442_p8, %p2441_p1 }
 0x9e6   : > { %p2444_p10 = pnand %p2443_p4, %p2437_p2 }
 0xa87   : > { %v1708_v30 = vpop.f32.mrb[20].mxu1 }
 0xa88   : > { %v1709_v31 = vadd.f32 %v1981_v29, %v1708_v30  ;;  %v2147_v32 = vpop.f32.mrb[21].mxu1 }
 0xa89   : > { %v1711_v33 = vpop.f32.mrb[22].mxu1 }
 0xa8a   : > { %v1714_v34 = vadd.f32 %v1709_v31, %v2952_v50  ;;  %v2148_v35 = vpop.f32.mrb[23].mxu1 }
 0xa8c   : > { %1715 = vst.msk [vmem:[%s649_s1] sm:$0xff] %vm676_vm0, %v1714_v34 }
 0xa8d   : > { %2447 = shalt.err (!%p2444_p10)
}
 0xa8e   : > { %s2448_s25 = scalar_lea.hbm %s3073_s2, 128  ;;  %s2452_s1 = scalar_lea.hbm %s3195_s24, 256 }
 0xa8f   : > { %p2449_p13 = scmp.ne.s32.totalorder %s3073_s2, %s2448_s25  ;;  %p2453_p6 = scmp.lt.u32.totalorder %s3073_s2, %s3195_s24 }
 0xa90   : > { %p2454_p7 = scmp.lt.u32.totalorder %s2452_s1, %s2448_s25  ;;  %p2456_p12 = scmp.lt.u32.totalorder %s2448_s25, %s3073_s2 }
 0xa91   : > { %p2450_p3 = pnand %p2449_p13, %p3191_p11 }
 0xa92   : > { %p2455_p9 = por %p2454_p7, %p2453_p6 }
 0xa93   : > { %p2451_p5 = pneg %p2450_p3 }
 0xa94   : > { %p2457_p0 = por %p2456_p12, %p2455_p9 }
 0xa96   : > { %p2458_p2 = pnand %p2457_p0, %p2451_p5 }
 0xa98   : > { %2461 = shalt.err (!%p2458_p2)
}
 0xa99   : > { %2161 = dma.vmem_to_hbm [thread:$0]  (%p3191_p11), %s3075_s29, 128, %s3073_s2, %s1717_s20  }
 0xa9a PF: > { %s3197_s27 = sld [smem:[#allocation22_spill]]  ;;  %s3198_s22 = sld [smem:[#allocation19_spill]] }
 0xa9b   : > { %s3199_s28 = sld [smem:[#allocation24_spill]] }
 0xaa0   : > { %p2193_p1 = scmp.ge.s32.totalorder %s3197_s27, 2  ;;  %s1779_s21 = sand.u32 1, %s3198_s22  }
 0xaa1   : > { %p3200_p8 = scmp.ne.s32.totalorder %s3199_s28, 0  ;;  %s1780_s19 = scalar_lea.sflag [#allocation7], %s1779_s21 }
 0xaa3   : > { %p2178_p4 = pnand %p2193_p1, %p3200_p8 }
 0xaa5   : > { %2495 = dma.done.wait (!%p2178_p4), %s1780_s19, 128  }
 0xaa6   : > { %2497 = vsyncadd (!%p2178_p4), %s1780_s19, 4294967168  ;;  %s3201_s25 = sadd.s32 4294967294, %s3197_s27  }
 0xaa7   : > { %s1788_s6 = sand.u32 1, %s3201_s25  }
 0xaa8   : > { %s1789_s26 = scalar_lea.sflag [#allocation13], %s1788_s6 }
 0xaa9   : > { %2499 = dma.done.wait (!%p2178_p4), %s1789_s26, 256  }
 0xaaa   : > { %2501 = vsyncadd (!%p2178_p4), %s1789_s26, 4294967040  ;;  %s38_s22 = sadd.s32 1, %s3197_s27   ;;  %s3202_s3 = sld [smem:[#allocation20_spill]] }
 0xaab   : > { %p35_p11 = scmp.ge.s32.totalorder %s38_s22, 4   ;;  %s3203_s20 = sld [smem:[#allocation25_spill]] }
 0xaac   : > { %s3204_s21 = sld [smem:[#allocation21_spill]]  ;;  %s3205_s1 = sld [smem:[#allocation23_spill]] }
 0xaad   : > { %s3206_s0 = smov %s2508_s30  ;;  %37 = sbr.rel (!%p35_p11) target bundleno = 17 (0x11), region = 183 }
 0xab0   : > { %s3207_s30 = smov %s3202_s3 }
 0xab4   :  { %1803 = vsyncpa [#allocation6], 1 }
 0xab5   :  { %1805 = vsyncpa [#allocation6 + $0x1], 1 }
 0xab6   :  { %1806 = vsyncpa [#allocation9], 1 }
 0xab7   :  { %1807 = vsyncpa [#allocation7], 1 }
 0xab8   :  { %1809 = vsyncpa [#allocation7 + $0x1], 1 }
 0xab9   :  { %1810 = vsyncpa [#allocation13], 1 }
 0xaba   :  { %1812 = vsyncpa [#allocation13 + $0x1], 1 }

</bundles_post_ra>
